<compile_context>
chip_gen: v7x
topology: tpu7x:2x2x1
jax: 0.10.0
libtpu: 0.0.40
codegen_flags: <defaults>
</compile_context>

<pallas_src>
import functools

import numpy as np
import jax
import jax.numpy as jnp
from jax import lax
from jax.experimental import pallas as pl
from jax.experimental.pallas import tpu as pltpu

CONV_KSIZES = (10, 7, 4, 4)   # kernel sizes from the torch module
CONV_CH = 8                   # small stand-in for the 64-channel conv outputs
HIDDEN = 32                   # small stand-in for the 4096-wide sigmoid layer
PAD = 1                       # padding=True -> padding=1 in torch


# ----------------------------------------------------------------------------
# Layer geometry
# ----------------------------------------------------------------------------
def make_plan(spatial):
    """Per-layer geometry dicts: k, cin, cout, hin, win, hp, wp, ho, wo."""
    plan = []
    cin, h, w = 1, spatial, spatial
    for k in CONV_KSIZES:
        hp, wp = h + 2 * PAD, w + 2 * PAD
        ho, wo = hp - k + 1, wp - k + 1
        plan.append(dict(k=k, cin=cin, cout=CONV_CH, hin=h, win=w,
                         hp=hp, wp=wp, ho=ho, wo=wo))
        cin, h, w = CONV_CH, ho, wo
    return plan


# ----------------------------------------------------------------------------
# Fused per-image feature kernel: 4x(conv+ReLU) -> flatten -> Linear+Sigmoid
# ----------------------------------------------------------------------------
def _features_kernel(*refs, plan):
    nl = len(plan)
    x_ref = refs[0]
    t_refs = refs[1:1 + nl]               # Toeplitz conv weights (K, Wp*Cin, Wo*Cout)
    b_refs = refs[1 + nl:1 + 2 * nl]      # biases tiled over W: (1, Wo*Cout)
    lw_ref = refs[1 + 2 * nl]             # (H4, W4*C, HIDDEN)
    lb_ref = refs[2 + 2 * nl]             # (1, HIDDEN)
    o_ref = refs[3 + 2 * nl]              # (1, HIDDEN)
    pad_refs = refs[4 + 2 * nl:]          # VMEM padded planes, one per layer

    # Zero the padded planes (borders must be zero; interiors are overwritten).
    for pref in pad_refs:
        pref[...] = jnp.zeros_like(pref)

    # Place the (H, W) single-channel input into the interior of plane 0.
    p0 = plan[0]
    pad_refs[0][1:1 + p0["hin"], 1:1 + p0["win"]] = x_ref[...]

    act = None
    for li, p in enumerate(plan):
        k, cout, ho, wo = p["k"], p["cout"], p["ho"], p["wo"]
        pad_ref = pad_refs[li]
        acc = jnp.zeros((ho, wo * cout), jnp.float32)
        # One 2-D matmul per kernel row (static unroll): contraction dim Wp*Cin.
        for i in range(k):
            acc = acc + jnp.dot(pad_ref[i:i + ho, :], t_refs[li][i],
                                preferred_element_type=jnp.float32)
        act = jnp.maximum(acc + b_refs[li][...], 0.0)       # bias (hoisted) + ReLU
        if li + 1 < nl:
            # Write into the interior of the next padded plane (pad=1 offsets).
            pad_refs[li + 1][1:1 + ho, cout:cout + wo * cout] = act

    # Linear(feat -> HIDDEN) + Sigmoid, contracting the (H4, W4*C) plane
    # row-by-row against the row-permuted weight (matches torch NCHW flatten).
    y = lb_ref[...]                                          # (1, HIDDEN)
    for h in range(plan[-1]["ho"]):
        y = y + jnp.dot(act[h:h + 1, :], lw_ref[h],
                        preferred_element_type=jnp.float32)
    o_ref[...] = jax.nn.sigmoid(y).astype(o_ref.dtype)


# ----------------------------------------------------------------------------
# Head kernel: |o1 - o2| -> Linear(HIDDEN, 1)
# ----------------------------------------------------------------------------
def _head_kernel(feat_ref, w_ref, b_ref, out_ref):
    n = out_ref.shape[0]
    d = jnp.abs(feat_ref[0:n, :] - feat_ref[n:2 * n, :])
    out_ref[...] = (jnp.dot(d, w_ref[...], preferred_element_type=jnp.float32)
                    + b_ref[...]).astype(out_ref.dtype)


# ----------------------------------------------------------------------------
# Forward (2 pallas_calls total: fused features on a parallel grid + tiny head)
# ----------------------------------------------------------------------------
def siamese_forward(x1, x2, prep, *, plan):
    n = x1.shape[0]
    nl = len(plan)
    p0, plast = plan[0], plan[-1]

    # Batch both branches: (2N, H, W) single-channel planes.
    x = jnp.concatenate([x1, x2], axis=0)[:, 0, :, :]

    in_specs = [pl.BlockSpec((None, p0["hin"], p0["win"]), lambda i: (i, 0, 0))]
    for p in plan:
        in_specs.append(pl.BlockSpec(
            (p["k"], p["wp"] * p["cin"], p["wo"] * p["cout"]),
            lambda i: (0, 0, 0)))
    for p in plan:
        in_specs.append(pl.BlockSpec((1, p["wo"] * p["cout"]), lambda i: (0, 0)))
    in_specs.append(pl.BlockSpec(
        (plast["ho"], plast["wo"] * plast["cout"], HIDDEN), lambda i: (0, 0, 0)))
    in_specs.append(pl.BlockSpec((1, HIDDEN), lambda i: (0, 0)))

    scratch = [pltpu.VMEM((p["hp"], p["wp"] * p["cin"]), jnp.float32)
               for p in plan]

    feats = pl.pallas_call(
        functools.partial(_features_kernel, plan=plan),
        out_shape=jax.ShapeDtypeStruct((2 * n, 1, HIDDEN), jnp.float32),
        grid=(2 * n,),
        in_specs=in_specs,
        out_specs=pl.BlockSpec((None, 1, HIDDEN), lambda i: (i, 0, 0)),
        scratch_shapes=scratch,
        compiler_params=pltpu.CompilerParams(dimension_semantics=("parallel",)),
    )(x,
      *[prep[f"t{l}"] for l in range(nl)],
      *[prep[f"b{l}"] for l in range(nl)],
      prep["lin_w3"], prep["lin_b"])

    feats = feats[:, 0, :]                                   # (2N, HIDDEN)

    out = pl.pallas_call(
        _head_kernel,
        out_shape=jax.ShapeDtypeStruct((n, 1), jnp.float32),
        grid=(1,),
        in_specs=[pl.BlockSpec((2 * n, HIDDEN), lambda i: (0, 0)),
                  pl.BlockSpec((HIDDEN, 1), lambda i: (0, 0)),
                  pl.BlockSpec((1, 1), lambda i: (0, 0))],
        out_specs=pl.BlockSpec((n, 1), lambda i: (0, 0)),
    )(feats, prep["out_w"], prep["out_b"])
    return out


# ----------------------------------------------------------------------------
# Parameters: raw torch-like params + host-side prep (Toeplitz expansion, etc.)
# ----------------------------------------------------------------------------
def init_params(key, spatial):
    plan = make_plan(spatial)
    params = {}
    for li, p in enumerate(plan):
        key, kw_, kb_ = jax.random.split(key, 3)
        fan_in = p["cin"] * p["k"] * p["k"]
        params[f"conv{li}_w"] = (jax.random.normal(
            kw_, (p["k"], p["k"], p["cin"], p["cout"]), jnp.float32)
            / jnp.sqrt(fan_in))
        params[f"conv{li}_b"] = 0.01 * jax.random.normal(
            kb_, (p["cout"],), jnp.float32)
    h4, w4, c4 = plan[-1]["ho"], plan[-1]["wo"], plan[-1]["cout"]
    feat = c4 * h4 * w4
    key, kl, kbl, ko, kbo = jax.random.split(key, 5)
    params["lin_w"] = jax.random.normal(kl, (feat, HIDDEN), jnp.float32) / jnp.sqrt(feat)
    params["lin_b"] = 0.01 * jax.random.normal(kbl, (HIDDEN,), jnp.float32)
    params["out_w"] = jax.random.normal(ko, (HIDDEN, 1), jnp.float32) / jnp.sqrt(HIDDEN)
    params["out_b"] = 0.01 * jax.random.normal(kbo, (1,), jnp.float32)
    return params


def prepare_params(params, spatial):
    """Host-side, one-time weight reshaping (im2col on weights, bias tiling)."""
    plan = make_plan(spatial)
    prep = {}
    for li, p in enumerate(plan):
        w = np.asarray(params[f"conv{li}_w"])               # (K, K, Cin, Cout)
        b = np.asarray(params[f"conv{li}_b"])               # (Cout,)
        k, cin, cout, wp, wo = p["k"], p["cin"], p["cout"], p["wp"], p["wo"]
        t = np.zeros((k, wp * cin, wo * cout), np.float32)
        for i in range(k):
            for j in range(k):
                for x in range(wo):
                    t[i, (x + j) * cin:(x + j + 1) * cin,
                         x * cout:(x + 1) * cout] = w[i, j]
        prep[f"t{li}"] = jnp.asarray(t)
        prep[f"b{li}"] = jnp.asarray(np.tile(b, wo)[None, :])
    h4, w4, c4 = plan[-1]["ho"], plan[-1]["wo"], plan[-1]["cout"]
    # Row-permute the Linear weight from torch NCHW-flatten order to the
    # kernel's (h, w, c) plane order -> mathematically identical Linear.
    lw = np.asarray(params["lin_w"])
    prep["lin_w3"] = jnp.asarray(
        lw.reshape(c4, h4, w4, HIDDEN).transpose(1, 2, 0, 3)
          .reshape(h4, w4 * c4, HIDDEN))
    prep["lin_b"] = jnp.asarray(np.asarray(params["lin_b"])[None, :])
    prep["out_w"] = params["out_w"]
    prep["out_b"] = jnp.asarray(np.asarray(params["out_b"])[None, :])
    return plan, prep


# ----------------------------------------------------------------------------
# Pure-JAX reference (correctness check only)
# ----------------------------------------------------------------------------
def ref_forward_one(x_nchw, params):
    x = jnp.transpose(x_nchw, (0, 2, 3, 1))
    for li in range(len(CONV_KSIZES)):
        w = params[f"conv{li}_w"]
        b = params[f"conv{li}_b"]
        x = lax.conv_general_dilated(
            x, w, (1, 1), [(PAD, PAD), (PAD, PAD)],
            dimension_numbers=("NHWC", "HWIO", "NHWC"))
        x = jnp.maximum(x + b, 0.0)
    x = jnp.transpose(x, (0, 3, 1, 2)).reshape(x.shape[0], -1)   # NCHW flatten
    return jax.nn.sigmoid(x @ params["lin_w"] + params["lin_b"])


def ref_forward(x1, x2, params):
    d = jnp.abs(ref_forward_one(x1, params) - ref_forward_one(x2, params))
    return d @ params["out_w"] + params["out_b"]


if __name__ == "__main__":
    key = jax.random.PRNGKey(0)
    k1, k2, kp = jax.random.split(key, 3)

    N, C, S = 2, 1, 16                          # small shapes: (2, 1, 16, 16)
    x1 = jax.random.normal(k1, (N, C, S, S), jnp.float32)
    x2 = jax.random.normal(k2, (N, C, S, S), jnp.float32)

    params = init_params(kp, spatial=S)
    plan, prep = prepare_params(params, spatial=S)

    fwd = jax.jit(functools.partial(siamese_forward, plan=plan))
    out = jax.block_until_ready(fwd(x1, x2, prep))
    ref = ref_forward(x1, x2, params)

    assert out.shape == (N, 1), out.shape
    assert jnp.allclose(out, ref, atol=1e-3, rtol=1e-3), (out, ref)
    print("KERNEL_OK")
</pallas_src>

<mosaic_0001>
module attributes {stable_mosaic.version = 11 : i64} {
  func.func @_head_kernel(%arg0: i32, %arg1: memref<4x32xf32, #tpu.memory_space<vmem>>, %arg2: memref<32x1xf32, #tpu.memory_space<vmem>>, %arg3: memref<1x1xf32, #tpu.memory_space<vmem>>, %arg4: memref<2x1xf32, #tpu.memory_space<vmem>>) attributes {dimension_semantics = [#tpu.dimension_semantics<arbitrary>], iteration_bounds = array<i64: 1>, scalar_prefetch = 0 : i64, scratch_operands = 0 : i64, tpu.core_type = #tpu.core_type<tc>, window_params = [{pipeline_mode = #tpu.pipeline_mode<synchronous>, transform_indices = @transform_0, window_bounds = array<i64: 4, 32>}, {pipeline_mode = #tpu.pipeline_mode<synchronous>, transform_indices = @transform_1, window_bounds = array<i64: 32, 1>}, {pipeline_mode = #tpu.pipeline_mode<synchronous>, transform_indices = @transform_2, window_bounds = array<i64: 1, 1>}, {pipeline_mode = #tpu.pipeline_mode<synchronous>, transform_indices = @transform_3, window_bounds = array<i64: 2, 1>}]} {
    %c0 = arith.constant 0 : index
    %c0_0 = arith.constant 0 : index
    %0 = vector.load %arg1[%c0, %c0_0] : memref<4x32xf32, #tpu.memory_space<vmem>>, vector<2x32xf32>
    %c2 = arith.constant 2 : index
    %c0_1 = arith.constant 0 : index
    %1 = vector.load %arg1[%c2, %c0_1] : memref<4x32xf32, #tpu.memory_space<vmem>>, vector<2x32xf32>
    %2 = arith.subf %0, %1 : vector<2x32xf32>
    %3 = math.absf %2 : vector<2x32xf32>
    %c0_2 = arith.constant 0 : index
    %c0_3 = arith.constant 0 : index
    %4 = vector.load %arg2[%c0_2, %c0_3] : memref<32x1xf32, #tpu.memory_space<vmem>>, vector<32x1xf32>
    %cst = arith.constant dense<0.000000e+00> : vector<2x1xf32>
    %5 = tpu.matmul %3, %4, %cst {dimension_numbers = #tpu.dot_dimension_numbers<[1], [0], [0], [1], [0, 0, 1, 1], [], []>} : vector<2x32xf32>, vector<32x1xf32>, vector<2x1xf32> -> vector<2x1xf32>
    %c0_4 = arith.constant 0 : index
    %c0_5 = arith.constant 0 : index
    %6 = vector.load %arg3[%c0_4, %c0_5] : memref<1x1xf32, #tpu.memory_space<vmem>>, vector<1x1xf32>
    %7 = vector.broadcast %6 : vector<1x1xf32> to vector<2x1xf32>
    %8 = arith.addf %5, %7 : vector<2x1xf32>
    %c0_6 = arith.constant 0 : index
    %c0_7 = arith.constant 0 : index
    %9 = vector.load %arg4[%c0_6, %c0_7] : memref<2x1xf32, #tpu.memory_space<vmem>>, vector<2x1xf32>
    tpu.vector_store %arg4[%c0_6, %c0_7], %8 {strides = array<i32>} : memref<2x1xf32, #tpu.memory_space<vmem>>, vector<2x1xf32>,
    return
  }
  func.func @transform_0(%arg0: i32) -> (i32, i32) {
    %c0_i32 = arith.constant 0 : i32
    %c0_i32_0 = arith.constant 0 : i32
    %c0_i32_1 = arith.constant 0 : i32
    return %c0_i32, %c0_i32_0 : i32, i32
  }
  func.func @transform_1(%arg0: i32) -> (i32, i32) {
    %c0_i32 = arith.constant 0 : i32
    %c0_i32_0 = arith.constant 0 : i32
    %c0_i32_1 = arith.constant 0 : i32
    return %c0_i32, %c0_i32_0 : i32, i32
  }
  func.func @transform_2(%arg0: i32) -> (i32, i32) {
    %c0_i32 = arith.constant 0 : i32
    %c0_i32_0 = arith.constant 0 : i32
    %c0_i32_1 = arith.constant 0 : i32
    return %c0_i32, %c0_i32_0 : i32, i32
  }
  func.func @transform_3(%arg0: i32) -> (i32, i32) {
    %c0_i32 = arith.constant 0 : i32
    %c0_i32_0 = arith.constant 0 : i32
    %c0_i32_1 = arith.constant 0 : i32
    return %c0_i32, %c0_i32_0 : i32, i32
  }
}

module attributes {stable_mosaic.version = 11 : i64} {
  func.func @_features_kernel(%arg0: i32, %arg1: memref<1x16x16xf32, #tpu.memory_space<vmem>>, %arg2: memref<10x18x72xf32, #tpu.memory_space<vmem>>, %arg3: memref<7x88x40xf32, #tpu.memory_space<vmem>>, %arg4: memref<4x56x32xf32, #tpu.memory_space<vmem>>, %arg5: memref<4x48x24xf32, #tpu.memory_space<vmem>>, %arg6: memref<1x72xf32, #tpu.memory_space<vmem>>, %arg7: memref<1x40xf32, #tpu.memory_space<vmem>>, %arg8: memref<1x32xf32, #tpu.memory_space<vmem>>, %arg9: memref<1x24xf32, #tpu.memory_space<vmem>>, %arg10: memref<3x24x32xf32, #tpu.memory_space<vmem>>, %arg11: memref<1x32xf32, #tpu.memory_space<vmem>>, %arg12: memref<1x1x32xf32, #tpu.memory_space<vmem>>, %arg13: memref<18x18xf32, #tpu.memory_space<vmem>>, %arg14: memref<11x88xf32, #tpu.memory_space<vmem>>, %arg15: memref<7x56xf32, #tpu.memory_space<vmem>>, %arg16: memref<6x48xf32, #tpu.memory_space<vmem>>) attributes {dimension_semantics = [#tpu.dimension_semantics<parallel>], iteration_bounds = array<i64: 4>, scalar_prefetch = 0 : i64, scratch_operands = 4 : i64, tpu.core_type = #tpu.core_type<tc>, window_params = [{transform_indices = @transform_0, window_bounds = array<i64: 1, 16, 16>}, {pipeline_mode = #tpu.pipeline_mode<synchronous>, transform_indices = @transform_1, window_bounds = array<i64: 10, 18, 72>}, {pipeline_mode = #tpu.pipeline_mode<synchronous>, transform_indices = @transform_2, window_bounds = array<i64: 7, 88, 40>}, {pipeline_mode = #tpu.pipeline_mode<synchronous>, transform_indices = @transform_3, window_bounds = array<i64: 4, 56, 32>}, {pipeline_mode = #tpu.pipeline_mode<synchronous>, transform_indices = @transform_4, window_bounds = array<i64: 4, 48, 24>}, {pipeline_mode = #tpu.pipeline_mode<synchronous>, transform_indices = @transform_5, window_bounds = array<i64: 1, 72>}, {pipeline_mode = #tpu.pipeline_mode<synchronous>, transform_indices = @transform_6, window_bounds = array<i64: 1, 40>}, {pipeline_mode = #tpu.pipeline_mode<synchronous>, transform_indices = @transform_7, window_bounds = array<i64: 1, 32>}, {pipeline_mode = #tpu.pipeline_mode<synchronous>, transform_indices = @transform_8, window_bounds = array<i64: 1, 24>}, {pipeline_mode = #tpu.pipeline_mode<synchronous>, transform_indices = @transform_9, window_bounds = array<i64: 3, 24, 32>}, {pipeline_mode = #tpu.pipeline_mode<synchronous>, transform_indices = @transform_10, window_bounds = array<i64: 1, 32>}, {transform_indices = @transform_11, window_bounds = array<i64: 1, 1, 32>}]} {
    %cst = arith.constant 0.000000e+00 : f32
    %0 = vector.broadcast %cst : f32 to vector<18x18xf32>
    %c0 = arith.constant 0 : index
    %c0_0 = arith.constant 0 : index
    %1 = vector.load %arg13[%c0, %c0_0] : memref<18x18xf32, #tpu.memory_space<vmem>>, vector<18x18xf32>
    tpu.vector_store %arg13[%c0, %c0_0], %0 {strides = array<i32>} : memref<18x18xf32, #tpu.memory_space<vmem>>, vector<18x18xf32>,
    %cst_1 = arith.constant 0.000000e+00 : f32
    %2 = vector.broadcast %cst_1 : f32 to vector<11x88xf32>
    %c0_2 = arith.constant 0 : index
    %c0_3 = arith.constant 0 : index
    %3 = vector.load %arg14[%c0_2, %c0_3] : memref<11x88xf32, #tpu.memory_space<vmem>>, vector<11x88xf32>
    tpu.vector_store %arg14[%c0_2, %c0_3], %2 {strides = array<i32>} : memref<11x88xf32, #tpu.memory_space<vmem>>, vector<11x88xf32>,
    %cst_4 = arith.constant 0.000000e+00 : f32
    %4 = vector.broadcast %cst_4 : f32 to vector<7x56xf32>
    %c0_5 = arith.constant 0 : index
    %c0_6 = arith.constant 0 : index
    %5 = vector.load %arg15[%c0_5, %c0_6] : memref<7x56xf32, #tpu.memory_space<vmem>>, vector<7x56xf32>
    tpu.vector_store %arg15[%c0_5, %c0_6], %4 {strides = array<i32>} : memref<7x56xf32, #tpu.memory_space<vmem>>, vector<7x56xf32>,
    %cst_7 = arith.constant 0.000000e+00 : f32
    %6 = vector.broadcast %cst_7 : f32 to vector<6x48xf32>
    %c0_8 = arith.constant 0 : index
    %c0_9 = arith.constant 0 : index
    %7 = vector.load %arg16[%c0_8, %c0_9] : memref<6x48xf32, #tpu.memory_space<vmem>>, vector<6x48xf32>
    tpu.vector_store %arg16[%c0_8, %c0_9], %6 {strides = array<i32>} : memref<6x48xf32, #tpu.memory_space<vmem>>, vector<6x48xf32>,
    %c0_10 = arith.constant 0 : index
    %c0_11 = arith.constant 0 : index
    %c0_12 = arith.constant 0 : index
    %8 = vector.load %arg1[%c0_10, %c0_11, %c0_12] : memref<1x16x16xf32, #tpu.memory_space<vmem>>, vector<1x16x16xf32>
    %9 = vector.shape_cast %8 : vector<1x16x16xf32> to vector<16x16xf32>
    %c1 = arith.constant 1 : index
    %c1_13 = arith.constant 1 : index
    %10 = vector.load %arg13[%c1, %c1_13] : memref<18x18xf32, #tpu.memory_space<vmem>>, vector<16x16xf32>
    tpu.vector_store %arg13[%c1, %c1_13], %9 {strides = array<i32>} : memref<18x18xf32, #tpu.memory_space<vmem>>, vector<16x16xf32>,
    %cst_14 = arith.constant 0.000000e+00 : f32
    %11 = vector.broadcast %cst_14 : f32 to vector<9x72xf32>
    %c0_15 = arith.constant 0 : index
    %c0_16 = arith.constant 0 : index
    %12 = vector.load %arg13[%c0_15, %c0_16] : memref<18x18xf32, #tpu.memory_space<vmem>>, vector<9x18xf32>
    %c0_17 = arith.constant 0 : index
    %c0_18 = arith.constant 0 : index
    %c0_19 = arith.constant 0 : index
    %13 = vector.load %arg2[%c0_17, %c0_18, %c0_19] : memref<10x18x72xf32, #tpu.memory_space<vmem>>, vector<1x18x72xf32>
    %14 = vector.shape_cast %13 : vector<1x18x72xf32> to vector<18x72xf32>
    %cst_20 = arith.constant dense<0.000000e+00> : vector<9x72xf32>
    %15 = tpu.matmul %12, %14, %cst_20 {dimension_numbers = #tpu.dot_dimension_numbers<[1], [0], [0], [1], [0, 0, 1, 1], [], []>} : vector<9x18xf32>, vector<18x72xf32>, vector<9x72xf32> -> vector<9x72xf32>
    %16 = arith.addf %11, %15 : vector<9x72xf32>
    %c1_21 = arith.constant 1 : index
    %c0_22 = arith.constant 0 : index
    %17 = vector.load %arg13[%c1_21, %c0_22] : memref<18x18xf32, #tpu.memory_space<vmem>>, vector<9x18xf32>
    %c1_23 = arith.constant 1 : index
    %c0_24 = arith.constant 0 : index
    %c0_25 = arith.constant 0 : index
    %18 = vector.load %arg2[%c1_23, %c0_24, %c0_25] : memref<10x18x72xf32, #tpu.memory_space<vmem>>, vector<1x18x72xf32>
    %19 = vector.shape_cast %18 : vector<1x18x72xf32> to vector<18x72xf32>
    %cst_26 = arith.constant dense<0.000000e+00> : vector<9x72xf32>
    %20 = tpu.matmul %17, %19, %cst_26 {dimension_numbers = #tpu.dot_dimension_numbers<[1], [0], [0], [1], [0, 0, 1, 1], [], []>} : vector<9x18xf32>, vector<18x72xf32>, vector<9x72xf32> -> vector<9x72xf32>
    %21 = arith.addf %16, %20 : vector<9x72xf32>
    %c2 = arith.constant 2 : index
    %c0_27 = arith.constant 0 : index
    %22 = vector.load %arg13[%c2, %c0_27] : memref<18x18xf32, #tpu.memory_space<vmem>>, vector<9x18xf32>
    %c2_28 = arith.constant 2 : index
    %c0_29 = arith.constant 0 : index
    %c0_30 = arith.constant 0 : index
    %23 = vector.load %arg2[%c2_28, %c0_29, %c0_30] : memref<10x18x72xf32, #tpu.memory_space<vmem>>, vector<1x18x72xf32>
    %24 = vector.shape_cast %23 : vector<1x18x72xf32> to vector<18x72xf32>
    %cst_31 = arith.constant dense<0.000000e+00> : vector<9x72xf32>
    %25 = tpu.matmul %22, %24, %cst_31 {dimension_numbers = #tpu.dot_dimension_numbers<[1], [0], [0], [1], [0, 0, 1, 1], [], []>} : vector<9x18xf32>, vector<18x72xf32>, vector<9x72xf32> -> vector<9x72xf32>
    %26 = arith.addf %21, %25 : vector<9x72xf32>
    %c3 = arith.constant 3 : index
    %c0_32 = arith.constant 0 : index
    %27 = vector.load %arg13[%c3, %c0_32] : memref<18x18xf32, #tpu.memory_space<vmem>>, vector<9x18xf32>
    %c3_33 = arith.constant 3 : index
    %c0_34 = arith.constant 0 : index
    %c0_35 = arith.constant 0 : index
    %28 = vector.load %arg2[%c3_33, %c0_34, %c0_35] : memref<10x18x72xf32, #tpu.memory_space<vmem>>, vector<1x18x72xf32>
    %29 = vector.shape_cast %28 : vector<1x18x72xf32> to vector<18x72xf32>
    %cst_36 = arith.constant dense<0.000000e+00> : vector<9x72xf32>
    %30 = tpu.matmul %27, %29, %cst_36 {dimension_numbers = #tpu.dot_dimension_numbers<[1], [0], [0], [1], [0, 0, 1, 1], [], []>} : vector<9x18xf32>, vector<18x72xf32>, vector<9x72xf32> -> vector<9x72xf32>
    %31 = arith.addf %26, %30 : vector<9x72xf32>
    %c4 = arith.constant 4 : index
    %c0_37 = arith.constant 0 : index
    %32 = vector.load %arg13[%c4, %c0_37] : memref<18x18xf32, #tpu.memory_space<vmem>>, vector<9x18xf32>
    %c4_38 = arith.constant 4 : index
    %c0_39 = arith.constant 0 : index
    %c0_40 = arith.constant 0 : index
    %33 = vector.load %arg2[%c4_38, %c0_39, %c0_40] : memref<10x18x72xf32, #tpu.memory_space<vmem>>, vector<1x18x72xf32>
    %34 = vector.shape_cast %33 : vector<1x18x72xf32> to vector<18x72xf32>
    %cst_41 = arith.constant dense<0.000000e+00> : vector<9x72xf32>
    %35 = tpu.matmul %32, %34, %cst_41 {dimension_numbers = #tpu.dot_dimension_numbers<[1], [0], [0], [1], [0, 0, 1, 1], [], []>} : vector<9x18xf32>, vector<18x72xf32>, vector<9x72xf32> -> vector<9x72xf32>
    %36 = arith.addf %31, %35 : vector<9x72xf32>
    %c5 = arith.constant 5 : index
    %c0_42 = arith.constant 0 : index
    %37 = vector.load %arg13[%c5, %c0_42] : memref<18x18xf32, #tpu.memory_space<vmem>>, vector<9x18xf32>
    %c5_43 = arith.constant 5 : index
    %c0_44 = arith.constant 0 : index
    %c0_45 = arith.constant 0 : index
    %38 = vector.load %arg2[%c5_43, %c0_44, %c0_45] : memref<10x18x72xf32, #tpu.memory_space<vmem>>, vector<1x18x72xf32>
    %39 = vector.shape_cast %38 : vector<1x18x72xf32> to vector<18x72xf32>
    %cst_46 = arith.constant dense<0.000000e+00> : vector<9x72xf32>
    %40 = tpu.matmul %37, %39, %cst_46 {dimension_numbers = #tpu.dot_dimension_numbers<[1], [0], [0], [1], [0, 0, 1, 1], [], []>} : vector<9x18xf32>, vector<18x72xf32>, vector<9x72xf32> -> vector<9x72xf32>
    %41 = arith.addf %36, %40 : vector<9x72xf32>
    %c6 = arith.constant 6 : index
    %c0_47 = arith.constant 0 : index
    %42 = vector.load %arg13[%c6, %c0_47] : memref<18x18xf32, #tpu.memory_space<vmem>>, vector<9x18xf32>
    %c6_48 = arith.constant 6 : index
    %c0_49 = arith.constant 0 : index
    %c0_50 = arith.constant 0 : index
    %43 = vector.load %arg2[%c6_48, %c0_49, %c0_50] : memref<10x18x72xf32, #tpu.memory_space<vmem>>, vector<1x18x72xf32>
    %44 = vector.shape_cast %43 : vector<1x18x72xf32> to vector<18x72xf32>
    %cst_51 = arith.constant dense<0.000000e+00> : vector<9x72xf32>
    %45 = tpu.matmul %42, %44, %cst_51 {dimension_numbers = #tpu.dot_dimension_numbers<[1], [0], [0], [1], [0, 0, 1, 1], [], []>} : vector<9x18xf32>, vector<18x72xf32>, vector<9x72xf32> -> vector<9x72xf32>
    %46 = arith.addf %41, %45 : vector<9x72xf32>
    %c7 = arith.constant 7 : index
    %c0_52 = arith.constant 0 : index
    %47 = vector.load %arg13[%c7, %c0_52] : memref<18x18xf32, #tpu.memory_space<vmem>>, vector<9x18xf32>
    %c7_53 = arith.constant 7 : index
    %c0_54 = arith.constant 0 : index
    %c0_55 = arith.constant 0 : index
    %48 = vector.load %arg2[%c7_53, %c0_54, %c0_55] : memref<10x18x72xf32, #tpu.memory_space<vmem>>, vector<1x18x72xf32>
    %49 = vector.shape_cast %48 : vector<1x18x72xf32> to vector<18x72xf32>
    %cst_56 = arith.constant dense<0.000000e+00> : vector<9x72xf32>
    %50 = tpu.matmul %47, %49, %cst_56 {dimension_numbers = #tpu.dot_dimension_numbers<[1], [0], [0], [1], [0, 0, 1, 1], [], []>} : vector<9x18xf32>, vector<18x72xf32>, vector<9x72xf32> -> vector<9x72xf32>
    %51 = arith.addf %46, %50 : vector<9x72xf32>
    %c8 = arith.constant 8 : index
    %c0_57 = arith.constant 0 : index
    %52 = vector.load %arg13[%c8, %c0_57] : memref<18x18xf32, #tpu.memory_space<vmem>>, vector<9x18xf32>
    %c8_58 = arith.constant 8 : index
    %c0_59 = arith.constant 0 : index
    %c0_60 = arith.constant 0 : index
    %53 = vector.load %arg2[%c8_58, %c0_59, %c0_60] : memref<10x18x72xf32, #tpu.memory_space<vmem>>, vector<1x18x72xf32>
    %54 = vector.shape_cast %53 : vector<1x18x72xf32> to vector<18x72xf32>
    %cst_61 = arith.constant dense<0.000000e+00> : vector<9x72xf32>
    %55 = tpu.matmul %52, %54, %cst_61 {dimension_numbers = #tpu.dot_dimension_numbers<[1], [0], [0], [1], [0, 0, 1, 1], [], []>} : vector<9x18xf32>, vector<18x72xf32>, vector<9x72xf32> -> vector<9x72xf32>
    %56 = arith.addf %51, %55 : vector<9x72xf32>
    %c9 = arith.constant 9 : index
    %c0_62 = arith.constant 0 : index
    %57 = vector.load %arg13[%c9, %c0_62] : memref<18x18xf32, #tpu.memory_space<vmem>>, vector<9x18xf32>
    %c9_63 = arith.constant 9 : index
    %c0_64 = arith.constant 0 : index
    %c0_65 = arith.constant 0 : index
    %58 = vector.load %arg2[%c9_63, %c0_64, %c0_65] : memref<10x18x72xf32, #tpu.memory_space<vmem>>, vector<1x18x72xf32>
    %59 = vector.shape_cast %58 : vector<1x18x72xf32> to vector<18x72xf32>
    %cst_66 = arith.constant dense<0.000000e+00> : vector<9x72xf32>
    %60 = tpu.matmul %57, %59, %cst_66 {dimension_numbers = #tpu.dot_dimension_numbers<[1], [0], [0], [1], [0, 0, 1, 1], [], []>} : vector<9x18xf32>, vector<18x72xf32>, vector<9x72xf32> -> vector<9x72xf32>
    %61 = arith.addf %56, %60 : vector<9x72xf32>
    %c0_67 = arith.constant 0 : index
    %c0_68 = arith.constant 0 : index
    %62 = vector.load %arg6[%c0_67, %c0_68] : memref<1x72xf32, #tpu.memory_space<vmem>>, vector<1x72xf32>
    %63 = vector.broadcast %62 : vector<1x72xf32> to vector<9x72xf32>
    %64 = arith.addf %61, %63 : vector<9x72xf32>
    %cst_69 = arith.constant 0.000000e+00 : f32
    %65 = vector.broadcast %cst_69 : f32 to vector<9x72xf32>
    %66 = arith.maximumf %64, %65 : vector<9x72xf32>
    %c1_70 = arith.constant 1 : index
    %c8_71 = arith.constant 8 : index
    %67 = vector.load %arg14[%c1_70, %c8_71] : memref<11x88xf32, #tpu.memory_space<vmem>>, vector<9x72xf32>
    tpu.vector_store %arg14[%c1_70, %c8_71], %66 {strides = array<i32>} : memref<11x88xf32, #tpu.memory_space<vmem>>, vector<9x72xf32>,
    %cst_72 = arith.constant 0.000000e+00 : f32
    %68 = vector.broadcast %cst_72 : f32 to vector<5x40xf32>
    %c0_73 = arith.constant 0 : index
    %c0_74 = arith.constant 0 : index
    %69 = vector.load %arg14[%c0_73, %c0_74] : memref<11x88xf32, #tpu.memory_space<vmem>>, vector<5x88xf32>
    %c0_75 = arith.constant 0 : index
    %c0_76 = arith.constant 0 : index
    %c0_77 = arith.constant 0 : index
    %70 = vector.load %arg3[%c0_75, %c0_76, %c0_77] : memref<7x88x40xf32, #tpu.memory_space<vmem>>, vector<1x88x40xf32>
    %71 = vector.shape_cast %70 : vector<1x88x40xf32> to vector<88x40xf32>
    %cst_78 = arith.constant dense<0.000000e+00> : vector<5x40xf32>
    %72 = tpu.matmul %69, %71, %cst_78 {dimension_numbers = #tpu.dot_dimension_numbers<[1], [0], [0], [1], [0, 0, 1, 1], [], []>} : vector<5x88xf32>, vector<88x40xf32>, vector<5x40xf32> -> vector<5x40xf32>
    %73 = arith.addf %68, %72 : vector<5x40xf32>
    %c1_79 = arith.constant 1 : index
    %c0_80 = arith.constant 0 : index
    %74 = vector.load %arg14[%c1_79, %c0_80] : memref<11x88xf32, #tpu.memory_space<vmem>>, vector<5x88xf32>
    %c1_81 = arith.constant 1 : index
    %c0_82 = arith.constant 0 : index
    %c0_83 = arith.constant 0 : index
    %75 = vector.load %arg3[%c1_81, %c0_82, %c0_83] : memref<7x88x40xf32, #tpu.memory_space<vmem>>, vector<1x88x40xf32>
    %76 = vector.shape_cast %75 : vector<1x88x40xf32> to vector<88x40xf32>
    %cst_84 = arith.constant dense<0.000000e+00> : vector<5x40xf32>
    %77 = tpu.matmul %74, %76, %cst_84 {dimension_numbers = #tpu.dot_dimension_numbers<[1], [0], [0], [1], [0, 0, 1, 1], [], []>} : vector<5x88xf32>, vector<88x40xf32>, vector<5x40xf32> -> vector<5x40xf32>
    %78 = arith.addf %73, %77 : vector<5x40xf32>
    %c2_85 = arith.constant 2 : index
    %c0_86 = arith.constant 0 : index
    %79 = vector.load %arg14[%c2_85, %c0_86] : memref<11x88xf32, #tpu.memory_space<vmem>>, vector<5x88xf32>
    %c2_87 = arith.constant 2 : index
    %c0_88 = arith.constant 0 : index
    %c0_89 = arith.constant 0 : index
    %80 = vector.load %arg3[%c2_87, %c0_88, %c0_89] : memref<7x88x40xf32, #tpu.memory_space<vmem>>, vector<1x88x40xf32>
    %81 = vector.shape_cast %80 : vector<1x88x40xf32> to vector<88x40xf32>
    %cst_90 = arith.constant dense<0.000000e+00> : vector<5x40xf32>
    %82 = tpu.matmul %79, %81, %cst_90 {dimension_numbers = #tpu.dot_dimension_numbers<[1], [0], [0], [1], [0, 0, 1, 1], [], []>} : vector<5x88xf32>, vector<88x40xf32>, vector<5x40xf32> -> vector<5x40xf32>
    %83 = arith.addf %78, %82 : vector<5x40xf32>
    %c3_91 = arith.constant 3 : index
    %c0_92 = arith.constant 0 : index
    %84 = vector.load %arg14[%c3_91, %c0_92] : memref<11x88xf32, #tpu.memory_space<vmem>>, vector<5x88xf32>
    %c3_93 = arith.constant 3 : index
    %c0_94 = arith.constant 0 : index
    %c0_95 = arith.constant 0 : index
    %85 = vector.load %arg3[%c3_93, %c0_94, %c0_95] : memref<7x88x40xf32, #tpu.memory_space<vmem>>, vector<1x88x40xf32>
    %86 = vector.shape_cast %85 : vector<1x88x40xf32> to vector<88x40xf32>
    %cst_96 = arith.constant dense<0.000000e+00> : vector<5x40xf32>
    %87 = tpu.matmul %84, %86, %cst_96 {dimension_numbers = #tpu.dot_dimension_numbers<[1], [0], [0], [1], [0, 0, 1, 1], [], []>} : vector<5x88xf32>, vector<88x40xf32>, vector<5x40xf32> -> vector<5x40xf32>
    %88 = arith.addf %83, %87 : vector<5x40xf32>
    %c4_97 = arith.constant 4 : index
    %c0_98 = arith.constant 0 : index
    %89 = vector.load %arg14[%c4_97, %c0_98] : memref<11x88xf32, #tpu.memory_space<vmem>>, vector<5x88xf32>
    %c4_99 = arith.constant 4 : index
    %c0_100 = arith.constant 0 : index
    %c0_101 = arith.constant 0 : index
    %90 = vector.load %arg3[%c4_99, %c0_100, %c0_101] : memref<7x88x40xf32, #tpu.memory_space<vmem>>, vector<1x88x40xf32>
    %91 = vector.shape_cast %90 : vector<1x88x40xf32> to vector<88x40xf32>
    %cst_102 = arith.constant dense<0.000000e+00> : vector<5x40xf32>
    %92 = tpu.matmul %89, %91, %cst_102 {dimension_numbers = #tpu.dot_dimension_numbers<[1], [0], [0], [1], [0, 0, 1, 1], [], []>} : vector<5x88xf32>, vector<88x40xf32>, vector<5x40xf32> -> vector<5x40xf32>
    %93 = arith.addf %88, %92 : vector<5x40xf32>
    %c5_103 = arith.constant 5 : index
    %c0_104 = arith.constant 0 : index
    %94 = vector.load %arg14[%c5_103, %c0_104] : memref<11x88xf32, #tpu.memory_space<vmem>>, vector<5x88xf32>
    %c5_105 = arith.constant 5 : index
    %c0_106 = arith.constant 0 : index
    %c0_107 = arith.constant 0 : index
    %95 = vector.load %arg3[%c5_105, %c0_106, %c0_107] : memref<7x88x40xf32, #tpu.memory_space<vmem>>, vector<1x88x40xf32>
    %96 = vector.shape_cast %95 : vector<1x88x40xf32> to vector<88x40xf32>
    %cst_108 = arith.constant dense<0.000000e+00> : vector<5x40xf32>
    %97 = tpu.matmul %94, %96, %cst_108 {dimension_numbers = #tpu.dot_dimension_numbers<[1], [0], [0], [1], [0, 0, 1, 1], [], []>} : vector<5x88xf32>, vector<88x40xf32>, vector<5x40xf32> -> vector<5x40xf32>
    %98 = arith.addf %93, %97 : vector<5x40xf32>
    %c6_109 = arith.constant 6 : index
    %c0_110 = arith.constant 0 : index
    %99 = vector.load %arg14[%c6_109, %c0_110] : memref<11x88xf32, #tpu.memory_space<vmem>>, vector<5x88xf32>
    %c6_111 = arith.constant 6 : index
    %c0_112 = arith.constant 0 : index
    %c0_113 = arith.constant 0 : index
    %100 = vector.load %arg3[%c6_111, %c0_112, %c0_113] : memref<7x88x40xf32, #tpu.memory_space<vmem>>, vector<1x88x40xf32>
    %101 = vector.shape_cast %100 : vector<1x88x40xf32> to vector<88x40xf32>
    %cst_114 = arith.constant dense<0.000000e+00> : vector<5x40xf32>
    %102 = tpu.matmul %99, %101, %cst_114 {dimension_numbers = #tpu.dot_dimension_numbers<[1], [0], [0], [1], [0, 0, 1, 1], [], []>} : vector<5x88xf32>, vector<88x40xf32>, vector<5x40xf32> -> vector<5x40xf32>
    %103 = arith.addf %98, %102 : vector<5x40xf32>
    %c0_115 = arith.constant 0 : index
    %c0_116 = arith.constant 0 : index
    %104 = vector.load %arg7[%c0_115, %c0_116] : memref<1x40xf32, #tpu.memory_space<vmem>>, vector<1x40xf32>
    %105 = vector.broadcast %104 : vector<1x40xf32> to vector<5x40xf32>
    %106 = arith.addf %103, %105 : vector<5x40xf32>
    %cst_117 = arith.constant 0.000000e+00 : f32
    %107 = vector.broadcast %cst_117 : f32 to vector<5x40xf32>
    %108 = arith.maximumf %106, %107 : vector<5x40xf32>
    %c1_118 = arith.constant 1 : index
    %c8_119 = arith.constant 8 : index
    %109 = vector.load %arg15[%c1_118, %c8_119] : memref<7x56xf32, #tpu.memory_space<vmem>>, vector<5x40xf32>
    tpu.vector_store %arg15[%c1_118, %c8_119], %108 {strides = array<i32>} : memref<7x56xf32, #tpu.memory_space<vmem>>, vector<5x40xf32>,
    %cst_120 = arith.constant 0.000000e+00 : f32
    %110 = vector.broadcast %cst_120 : f32 to vector<4x32xf32>
    %c0_121 = arith.constant 0 : index
    %c0_122 = arith.constant 0 : index
    %111 = vector.load %arg15[%c0_121, %c0_122] : memref<7x56xf32, #tpu.memory_space<vmem>>, vector<4x56xf32>
    %c0_123 = arith.constant 0 : index
    %c0_124 = arith.constant 0 : index
    %c0_125 = arith.constant 0 : index
    %112 = vector.load %arg4[%c0_123, %c0_124, %c0_125] : memref<4x56x32xf32, #tpu.memory_space<vmem>>, vector<1x56x32xf32>
    %113 = vector.shape_cast %112 : vector<1x56x32xf32> to vector<56x32xf32>
    %cst_126 = arith.constant dense<0.000000e+00> : vector<4x32xf32>
    %114 = tpu.matmul %111, %113, %cst_126 {dimension_numbers = #tpu.dot_dimension_numbers<[1], [0], [0], [1], [0, 0, 1, 1], [], []>} : vector<4x56xf32>, vector<56x32xf32>, vector<4x32xf32> -> vector<4x32xf32>
    %115 = arith.addf %110, %114 : vector<4x32xf32>
    %c1_127 = arith.constant 1 : index
    %c0_128 = arith.constant 0 : index
    %116 = vector.load %arg15[%c1_127, %c0_128] : memref<7x56xf32, #tpu.memory_space<vmem>>, vector<4x56xf32>
    %c1_129 = arith.constant 1 : index
    %c0_130 = arith.constant 0 : index
    %c0_131 = arith.constant 0 : index
    %117 = vector.load %arg4[%c1_129, %c0_130, %c0_131] : memref<4x56x32xf32, #tpu.memory_space<vmem>>, vector<1x56x32xf32>
    %118 = vector.shape_cast %117 : vector<1x56x32xf32> to vector<56x32xf32>
    %cst_132 = arith.constant dense<0.000000e+00> : vector<4x32xf32>
    %119 = tpu.matmul %116, %118, %cst_132 {dimension_numbers = #tpu.dot_dimension_numbers<[1], [0], [0], [1], [0, 0, 1, 1], [], []>} : vector<4x56xf32>, vector<56x32xf32>, vector<4x32xf32> -> vector<4x32xf32>
    %120 = arith.addf %115, %119 : vector<4x32xf32>
    %c2_133 = arith.constant 2 : index
    %c0_134 = arith.constant 0 : index
    %121 = vector.load %arg15[%c2_133, %c0_134] : memref<7x56xf32, #tpu.memory_space<vmem>>, vector<4x56xf32>
    %c2_135 = arith.constant 2 : index
    %c0_136 = arith.constant 0 : index
    %c0_137 = arith.constant 0 : index
    %122 = vector.load %arg4[%c2_135, %c0_136, %c0_137] : memref<4x56x32xf32, #tpu.memory_space<vmem>>, vector<1x56x32xf32>
    %123 = vector.shape_cast %122 : vector<1x56x32xf32> to vector<56x32xf32>
    %cst_138 = arith.constant dense<0.000000e+00> : vector<4x32xf32>
    %124 = tpu.matmul %121, %123, %cst_138 {dimension_numbers = #tpu.dot_dimension_numbers<[1], [0], [0], [1], [0, 0, 1, 1], [], []>} : vector<4x56xf32>, vector<56x32xf32>, vector<4x32xf32> -> vector<4x32xf32>
    %125 = arith.addf %120, %124 : vector<4x32xf32>
    %c3_139 = arith.constant 3 : index
    %c0_140 = arith.constant 0 : index
    %126 = vector.load %arg15[%c3_139, %c0_140] : memref<7x56xf32, #tpu.memory_space<vmem>>, vector<4x56xf32>
    %c3_141 = arith.constant 3 : index
    %c0_142 = arith.constant 0 : index
    %c0_143 = arith.constant 0 : index
    %127 = vector.load %arg4[%c3_141, %c0_142, %c0_143] : memref<4x56x32xf32, #tpu.memory_space<vmem>>, vector<1x56x32xf32>
    %128 = vector.shape_cast %127 : vector<1x56x32xf32> to vector<56x32xf32>
    %cst_144 = arith.constant dense<0.000000e+00> : vector<4x32xf32>
    %129 = tpu.matmul %126, %128, %cst_144 {dimension_numbers = #tpu.dot_dimension_numbers<[1], [0], [0], [1], [0, 0, 1, 1], [], []>} : vector<4x56xf32>, vector<56x32xf32>, vector<4x32xf32> -> vector<4x32xf32>
    %130 = arith.addf %125, %129 : vector<4x32xf32>
    %c0_145 = arith.constant 0 : index
    %c0_146 = arith.constant 0 : index
    %131 = vector.load %arg8[%c0_145, %c0_146] : memref<1x32xf32, #tpu.memory_space<vmem>>, vector<1x32xf32>
    %132 = vector.broadcast %131 : vector<1x32xf32> to vector<4x32xf32>
    %133 = arith.addf %130, %132 : vector<4x32xf32>
    %cst_147 = arith.constant 0.000000e+00 : f32
    %134 = vector.broadcast %cst_147 : f32 to vector<4x32xf32>
    %135 = arith.maximumf %133, %134 : vector<4x32xf32>
    %c1_148 = arith.constant 1 : index
    %c8_149 = arith.constant 8 : index
    %136 = vector.load %arg16[%c1_148, %c8_149] : memref<6x48xf32, #tpu.memory_space<vmem>>, vector<4x32xf32>
    tpu.vector_store %arg16[%c1_148, %c8_149], %135 {strides = array<i32>} : memref<6x48xf32, #tpu.memory_space<vmem>>, vector<4x32xf32>,
    %cst_150 = arith.constant 0.000000e+00 : f32
    %137 = vector.broadcast %cst_150 : f32 to vector<3x24xf32>
    %c0_151 = arith.constant 0 : index
    %c0_152 = arith.constant 0 : index
    %138 = vector.load %arg16[%c0_151, %c0_152] : memref<6x48xf32, #tpu.memory_space<vmem>>, vector<3x48xf32>
    %c0_153 = arith.constant 0 : index
    %c0_154 = arith.constant 0 : index
    %c0_155 = arith.constant 0 : index
    %139 = vector.load %arg5[%c0_153, %c0_154, %c0_155] : memref<4x48x24xf32, #tpu.memory_space<vmem>>, vector<1x48x24xf32>
    %140 = vector.shape_cast %139 : vector<1x48x24xf32> to vector<48x24xf32>
    %cst_156 = arith.constant dense<0.000000e+00> : vector<3x24xf32>
    %141 = tpu.matmul %138, %140, %cst_156 {dimension_numbers = #tpu.dot_dimension_numbers<[1], [0], [0], [1], [0, 0, 1, 1], [], []>} : vector<3x48xf32>, vector<48x24xf32>, vector<3x24xf32> -> vector<3x24xf32>
    %142 = arith.addf %137, %141 : vector<3x24xf32>
    %c1_157 = arith.constant 1 : index
    %c0_158 = arith.constant 0 : index
    %143 = vector.load %arg16[%c1_157, %c0_158] : memref<6x48xf32, #tpu.memory_space<vmem>>, vector<3x48xf32>
    %c1_159 = arith.constant 1 : index
    %c0_160 = arith.constant 0 : index
    %c0_161 = arith.constant 0 : index
    %144 = vector.load %arg5[%c1_159, %c0_160, %c0_161] : memref<4x48x24xf32, #tpu.memory_space<vmem>>, vector<1x48x24xf32>
    %145 = vector.shape_cast %144 : vector<1x48x24xf32> to vector<48x24xf32>
    %cst_162 = arith.constant dense<0.000000e+00> : vector<3x24xf32>
    %146 = tpu.matmul %143, %145, %cst_162 {dimension_numbers = #tpu.dot_dimension_numbers<[1], [0], [0], [1], [0, 0, 1, 1], [], []>} : vector<3x48xf32>, vector<48x24xf32>, vector<3x24xf32> -> vector<3x24xf32>
    %147 = arith.addf %142, %146 : vector<3x24xf32>
    %c2_163 = arith.constant 2 : index
    %c0_164 = arith.constant 0 : index
    %148 = vector.load %arg16[%c2_163, %c0_164] : memref<6x48xf32, #tpu.memory_space<vmem>>, vector<3x48xf32>
    %c2_165 = arith.constant 2 : index
    %c0_166 = arith.constant 0 : index
    %c0_167 = arith.constant 0 : index
    %149 = vector.load %arg5[%c2_165, %c0_166, %c0_167] : memref<4x48x24xf32, #tpu.memory_space<vmem>>, vector<1x48x24xf32>
    %150 = vector.shape_cast %149 : vector<1x48x24xf32> to vector<48x24xf32>
    %cst_168 = arith.constant dense<0.000000e+00> : vector<3x24xf32>
    %151 = tpu.matmul %148, %150, %cst_168 {dimension_numbers = #tpu.dot_dimension_numbers<[1], [0], [0], [1], [0, 0, 1, 1], [], []>} : vector<3x48xf32>, vector<48x24xf32>, vector<3x24xf32> -> vector<3x24xf32>
    %152 = arith.addf %147, %151 : vector<3x24xf32>
    %c3_169 = arith.constant 3 : index
    %c0_170 = arith.constant 0 : index
    %153 = vector.load %arg16[%c3_169, %c0_170] : memref<6x48xf32, #tpu.memory_space<vmem>>, vector<3x48xf32>
    %c3_171 = arith.constant 3 : index
    %c0_172 = arith.constant 0 : index
    %c0_173 = arith.constant 0 : index
    %154 = vector.load %arg5[%c3_171, %c0_172, %c0_173] : memref<4x48x24xf32, #tpu.memory_space<vmem>>, vector<1x48x24xf32>
    %155 = vector.shape_cast %154 : vector<1x48x24xf32> to vector<48x24xf32>
    %cst_174 = arith.constant dense<0.000000e+00> : vector<3x24xf32>
    %156 = tpu.matmul %153, %155, %cst_174 {dimension_numbers = #tpu.dot_dimension_numbers<[1], [0], [0], [1], [0, 0, 1, 1], [], []>} : vector<3x48xf32>, vector<48x24xf32>, vector<3x24xf32> -> vector<3x24xf32>
    %157 = arith.addf %152, %156 : vector<3x24xf32>
    %c0_175 = arith.constant 0 : index
    %c0_176 = arith.constant 0 : index
    %158 = vector.load %arg9[%c0_175, %c0_176] : memref<1x24xf32, #tpu.memory_space<vmem>>, vector<1x24xf32>
    %159 = vector.broadcast %158 : vector<1x24xf32> to vector<3x24xf32>
    %160 = arith.addf %157, %159 : vector<3x24xf32>
    %cst_177 = arith.constant 0.000000e+00 : f32
    %161 = vector.broadcast %cst_177 : f32 to vector<3x24xf32>
    %162 = arith.maximumf %160, %161 : vector<3x24xf32>
    %c0_178 = arith.constant 0 : index
    %c0_179 = arith.constant 0 : index
    %163 = vector.load %arg11[%c0_178, %c0_179] : memref<1x32xf32, #tpu.memory_space<vmem>>, vector<1x32xf32>
    %164 = vector.extract_strided_slice %162 {offsets = [0, 0], sizes = [1, 24], strides = [1, 1]} : vector<3x24xf32> to vector<1x24xf32>
    %c0_180 = arith.constant 0 : index
    %c0_181 = arith.constant 0 : index
    %c0_182 = arith.constant 0 : index
    %165 = vector.load %arg10[%c0_180, %c0_181, %c0_182] : memref<3x24x32xf32, #tpu.memory_space<vmem>>, vector<1x24x32xf32>
    %166 = vector.shape_cast %165 : vector<1x24x32xf32> to vector<24x32xf32>
    %cst_183 = arith.constant dense<0.000000e+00> : vector<1x32xf32>
    %167 = tpu.matmul %164, %166, %cst_183 {dimension_numbers = #tpu.dot_dimension_numbers<[1], [0], [0], [1], [0, 0, 1, 1], [], []>} : vector<1x24xf32>, vector<24x32xf32>, vector<1x32xf32> -> vector<1x32xf32>
    %168 = arith.addf %163, %167 : vector<1x32xf32>
    %169 = vector.extract_strided_slice %162 {offsets = [1, 0], sizes = [1, 24], strides = [1, 1]} : vector<3x24xf32> to vector<1x24xf32>
    %c1_184 = arith.constant 1 : index
    %c0_185 = arith.constant 0 : index
    %c0_186 = arith.constant 0 : index
    %170 = vector.load %arg10[%c1_184, %c0_185, %c0_186] : memref<3x24x32xf32, #tpu.memory_space<vmem>>, vector<1x24x32xf32>
    %171 = vector.shape_cast %170 : vector<1x24x32xf32> to vector<24x32xf32>
    %cst_187 = arith.constant dense<0.000000e+00> : vector<1x32xf32>
    %172 = tpu.matmul %169, %171, %cst_187 {dimension_numbers = #tpu.dot_dimension_numbers<[1], [0], [0], [1], [0, 0, 1, 1], [], []>} : vector<1x24xf32>, vector<24x32xf32>, vector<1x32xf32> -> vector<1x32xf32>
    %173 = arith.addf %168, %172 : vector<1x32xf32>
    %174 = vector.extract_strided_slice %162 {offsets = [2, 0], sizes = [1, 24], strides = [1, 1]} : vector<3x24xf32> to vector<1x24xf32>
    %c2_188 = arith.constant 2 : index
    %c0_189 = arith.constant 0 : index
    %c0_190 = arith.constant 0 : index
    %175 = vector.load %arg10[%c2_188, %c0_189, %c0_190] : memref<3x24x32xf32, #tpu.memory_space<vmem>>, vector<1x24x32xf32>
    %176 = vector.shape_cast %175 : vector<1x24x32xf32> to vector<24x32xf32>
    %cst_191 = arith.constant dense<0.000000e+00> : vector<1x32xf32>
    %177 = tpu.matmul %174, %176, %cst_191 {dimension_numbers = #tpu.dot_dimension_numbers<[1], [0], [0], [1], [0, 0, 1, 1], [], []>} : vector<1x24xf32>, vector<24x32xf32>, vector<1x32xf32> -> vector<1x32xf32>
    %178 = arith.addf %173, %177 : vector<1x32xf32>
    %179 = arith.negf %178 : vector<1x32xf32>
    %180 = math.exp %179 : vector<1x32xf32>
    %cst_192 = arith.constant 1.000000e+00 : f32
    %181 = vector.broadcast %cst_192 : f32 to vector<1x32xf32>
    %182 = arith.addf %181, %180 : vector<1x32xf32>
    %183 = arith.divf %181, %182 : vector<1x32xf32>
    %c0_193 = arith.constant 0 : index
    %c0_194 = arith.constant 0 : index
    %c0_195 = arith.constant 0 : index
    %184 = vector.load %arg12[%c0_193, %c0_194, %c0_195] : memref<1x1x32xf32, #tpu.memory_space<vmem>>, vector<1x1x32xf32>
    %185 = vector.shape_cast %184 : vector<1x1x32xf32> to vector<1x32xf32>
    %186 = vector.shape_cast %183 : vector<1x32xf32> to vector<1x1x32xf32>
    tpu.vector_store %arg12[%c0_193, %c0_194, %c0_195], %186 {strides = array<i32>} : memref<1x1x32xf32, #tpu.memory_space<vmem>>, vector<1x1x32xf32>,
    return
  }
  func.func @transform_0(%arg0: i32) -> (i32, i32, i32) {
    %c0_i32 = arith.constant 0 : i32
    %c0_i32_0 = arith.constant 0 : i32
    %c0_i32_1 = arith.constant 0 : i32
    return %arg0, %c0_i32, %c0_i32_0 : i32, i32, i32
  }
  func.func @transform_1(%arg0: i32) -> (i32, i32, i32) {
    %c0_i32 = arith.constant 0 : i32
    %c0_i32_0 = arith.constant 0 : i32
    %c0_i32_1 = arith.constant 0 : i32
    %c0_i32_2 = arith.constant 0 : i32
    return %c0_i32, %c0_i32_0, %c0_i32_1 : i32, i32, i32
  }
  func.func @transform_2(%arg0: i32) -> (i32, i32, i32) {
    %c0_i32 = arith.constant 0 : i32
    %c0_i32_0 = arith.constant 0 : i32
    %c0_i32_1 = arith.constant 0 : i32
    %c0_i32_2 = arith.constant 0 : i32
    return %c0_i32, %c0_i32_0, %c0_i32_1 : i32, i32, i32
  }
  func.func @transform_3(%arg0: i32) -> (i32, i32, i32) {
    %c0_i32 = arith.constant 0 : i32
    %c0_i32_0 = arith.constant 0 : i32
    %c0_i32_1 = arith.constant 0 : i32
    %c0_i32_2 = arith.constant 0 : i32
    return %c0_i32, %c0_i32_0, %c0_i32_1 : i32, i32, i32
  }
  func.func @transform_4(%arg0: i32) -> (i32, i32, i32) {
    %c0_i32 = arith.constant 0 : i32
    %c0_i32_0 = arith.constant 0 : i32
    %c0_i32_1 = arith.constant 0 : i32
    %c0_i32_2 = arith.constant 0 : i32
    return %c0_i32, %c0_i32_0, %c0_i32_1 : i32, i32, i32
  }
  func.func @transform_5(%arg0: i32) -> (i32, i32) {
    %c0_i32 = arith.constant 0 : i32
    %c0_i32_0 = arith.constant 0 : i32
    %c0_i32_1 = arith.constant 0 : i32
    return %c0_i32, %c0_i32_0 : i32, i32
  }
  func.func @transform_6(%arg0: i32) -> (i32, i32) {
    %c0_i32 = arith.constant 0 : i32
    %c0_i32_0 = arith.constant 0 : i32
    %c0_i32_1 = arith.constant 0 : i32
    return %c0_i32, %c0_i32_0 : i32, i32
  }
  func.func @transform_7(%arg0: i32) -> (i32, i32) {
    %c0_i32 = arith.constant 0 : i32
    %c0_i32_0 = arith.constant 0 : i32
    %c0_i32_1 = arith.constant 0 : i32
    return %c0_i32, %c0_i32_0 : i32, i32
  }
  func.func @transform_8(%arg0: i32) -> (i32, i32) {
    %c0_i32 = arith.constant 0 : i32
    %c0_i32_0 = arith.constant 0 : i32
    %c0_i32_1 = arith.constant 0 : i32
    return %c0_i32, %c0_i32_0 : i32, i32
  }
  func.func @transform_9(%arg0: i32) -> (i32, i32, i32) {
    %c0_i32 = arith.constant 0 : i32
    %c0_i32_0 = arith.constant 0 : i32
    %c0_i32_1 = arith.constant 0 : i32
    %c0_i32_2 = arith.constant 0 : i32
    return %c0_i32, %c0_i32_0, %c0_i32_1 : i32, i32, i32
  }
  func.func @transform_10(%arg0: i32) -> (i32, i32) {
    %c0_i32 = arith.constant 0 : i32
    %c0_i32_0 = arith.constant 0 : i32
    %c0_i32_1 = arith.constant 0 : i32
    return %c0_i32, %c0_i32_0 : i32, i32
  }
  func.func @transform_11(%arg0: i32) -> (i32, i32, i32) {
    %c0_i32 = arith.constant 0 : i32
    %c0_i32_0 = arith.constant 0 : i32
    %c0_i32_1 = arith.constant 0 : i32
    return %arg0, %c0_i32, %c0_i32_0 : i32, i32, i32
  }
}

</mosaic_0001>

<bundles_post_ra>
// kernel: siamese_forward.3
= control target key start
LH: loop header
LB: loop body
LE: loop exit
PB: predicated region body
PF: predicated region fallthrough
CT: control target
= control target key end

     0   :  { %v138_v0 = vmov 0.0|0.0   ;;  %vm139_vm0 = vmmov 0   ;;  %v140_v4 = vmov 0.0   ;;  %vm31_vm1 = vcmask 261120   ;;  %s185_s1 = inlined_call_operand.vmem [shape: f32[32,1], index: 1, kind: input, shape index: {}]   ;;  %s186_s0 = inlined_call_operand.vmem [shape: f32[4,32], index: 0, kind: input, shape index: {}]   ;;  %s187_s2 = inlined_call_operand.<no memory space> [shape: f32[1,1], index: 2, kind: input, shape index: {}]   ;;  %s188_s3 = inlined_call_operand.vmem [shape: f32[2,1], index: 3, kind: output, shape index: {}]  }
   0x1   :  { %129 = vmatprep.subr.bf16.mxu0 %v138_v0  ;;  %v20_v1 = vld [vmem:[%s185_s1] sm:$0xff]  ;;  %v21_v2 = vld [vmem:[%s185_s1 + $0x8] sm:$0xff]  ;;  %v22_v3 = vld [vmem:[%s185_s1 + $0x10] sm:$0xff]  ;;  %126 = vmatprep.mubr.msk.f32.mxu0 %vm139_vm0, %v140_v4  ;;  %v8_v5 = vstv %s187_s2  ;;  %vm105_vm2 = vcmask 1024  }
   0x2   :  { %v130_v6 = vpack.c.bf16 %v21_v2, %v20_v1  ;;  %v23_v7 = vld [vmem:[%s185_s1 + $0x18] sm:$0xff]  ;;  %v16_v8 = vld [vmem:[%s186_s0] sm:$0x3]  ;;  %v17_v9 = vld [vmem:[%s186_s0 + $0x2] sm:$0x3] }
   0x3   :  { %9 = vst [vmem:[#allocation2] sm:$0x1] %v8_v5  ;;  %v18_v10 = vsub.f32 %v16_v8, %v17_v9  ;;  %v133_v11 = vpack.c.bf16 %v23_v7, %v22_v3 }
   0x4   :  { %131 = vmatpush3.bf16.msra.mxu0 %v130_v6 }
   0x5   :  { %132 = vmatprep.subr.bf16.mxu0 %v138_v0  ;;  %v19_v12 = vand.u32 2147483647, %v18_v10 }
   0x8   :  { %134 = vmatpush3.bf16.msra.mxu0 %v133_v11 }
   0xa   :  { %v111_v13 = vld [vmem:[#allocation2] ss:$0 sm:$0xff] }
   0xb   :  { %127 = vmatmul.mubr.msk.f32.vlgmr.msra.gmra.mrb[0].mxu0 %vm31_vm1, %v19_v12 }
  0xde   :  { %v101_v14 = vpop.f32.mrb[0].mxu0 }
  0xdf   :  { %v102_v15 = vadd.f32 %v111_v13, %v101_v14  ;;  %v128_v16 = vpop.f32.mrb[1].mxu0 }
  0xe1   :  { %106 = vst.msk [vmem:[%s188_s3] sm:$0x3] %vm105_vm2, %v102_v15 }

// kernel: siamese_forward.2
= control target key start
LH: loop header
LB: loop body
LE: loop exit
PB: predicated region body
PF: predicated region fallthrough
CT: control target
= control target key end

     0   :  { %s4105_s17 = smov 0   ;;  %s4829_s0 = inlined_call_operand.vmem [shape: f32[4,16,16], index: 0, kind: input, shape index: {}]   ;;  %s4830_s1 = inlined_call_operand.vmem [shape: f32[10,18,72], index: 1, kind: input, shape index: {}]   ;;  %s4831_s2 = inlined_call_operand.vmem [shape: f32[7,88,40], index: 2, kind: input, shape index: {}]   ;;  %s4832_s3 = inlined_call_operand.vmem [shape: f32[4,56,32], index: 3, kind: input, shape index: {}]   ;;  %s4833_s4 = inlined_call_operand.vmem [shape: f32[4,48,24], index: 4, kind: input, shape index: {}]   ;;  %s4834_s5 = inlined_call_operand.vmem [shape: f32[1,72], index: 5, kind: input, shape index: {}]   ;;  %s4835_s6 = inlined_call_operand.vmem [shape: f32[1,40], index: 6, kind: input, shape index: {}]   ;;  %s4836_s7 = inlined_call_operand.vmem [shape: f32[1,32], index: 7, kind: input, shape index: {}]   ;;  %s4837_s8 = inlined_call_operand.vmem [shape: f32[1,24], index: 8, kind: input, shape index: {}]   ;;  %s4838_s9 = inlined_call_operand.vmem [shape: f32[3,24,32], index: 9, kind: input, shape index: {}]   ;;  %s4839_s10 = inlined_call_operand.vmem [shape: f32[1,32], index: 10, kind: input, shape index: {}]   ;;  %s4840_s11 = inlined_call_operand.vmem [shape: f32[4,1,32], index: 11, kind: output, shape index: {}]  }
   0x1 LB: > { %s2939_s18 = sadd.s32 4294967295, %s4038_s17   ;;  %p2943_p0 = scmp.ge.s32.totalorder %s4038_s17, 1  ;;  %s4038_s17 = sphi %s4105_s17, %s21_s17  }
   0x2   : > { %p337_p1 = scmp.lt.s32.totalorder %s4038_s17, 5 }
   0x4   : > { %p338_p2 = pnand %p2943_p0, %p337_p1 }
   0x5   : > { %p375_p3 = scmp.lt.s32.totalorder (!%p338_p2), %s2939_s18, 3  ;;  %vm383_vm0 = vcmask (!%p338_p2), 146432   ;;  %v411_v0 = vld [vmem:[%s4830_s1] sm:$0xff] (!%p338_p2)  ;;  %v4040_v1 = vmov (!%p338_p2), 0.0   ;;  %v412_v2 = vld [vmem:[%s4830_s1 + $0x8] sm:$0xff] (!%p338_p2)  ;;  %vm386_vm1 = vcmask (!%p338_p2), 140288  }
   0x6   : > { %341 = sbr.rel (%p338_p2) target bundleno = 1824 (0x720), region = 64  ;;  %384 = vst.msk [vmem:[#allocation2] sm:$0xff] (!%p338_p2), %vm383_vm0, %v4040_v1  ;;  %385 = vst.msk [vmem:[#allocation2 + $0x8] sm:$0xff] (!%p338_p2), %vm383_vm0, %v4040_v1  ;;  %v2946_v3 = vld [vmem:[%s4830_s1 + $0x18] sm:$0xff] (!%p338_p2)  ;;  %v3770_v4 = vpack.c.bf16 (!%p338_p2), %v412_v2, %v411_v0  ;;  %v2947_v5 = vld [vmem:[%s4830_s1 + $0x20] sm:$0xff] (!%p338_p2)  ;;  %vm426_vm2 = vcmask (!%p338_p2), 1041408  }
   0x7   : > { %387 = vst.msk [vmem:[#allocation2 + $0x10] sm:$0x3] (!%p338_p2), %vm386_vm1, %v4040_v1  ;;  %v413_v6 = vld [vmem:[%s4830_s1 + $0x10] sm:$0x3] (!%p338_p2)  ;;  %v2956_v8 = vld [vmem:[%s4830_s1 + $0x38] sm:$0xff] (!%p338_p2)  ;;  %v3766_v9 = vpack.c.bf16 (!%p338_p2), %v2947_v5, %v2946_v3  ;;  %s4041_s22 = smov (!%p338_p2), 1  }
   0x8   : > { %v2955_v7 = vld [vmem:[%s4830_s1 + $0x30] sm:$0xff] (!%p338_p2)  ;;  %3771 = vmatprep.subr.bf16.mxu0 (!%p338_p2), %v3770_v4  ;;  %v2948_v12 = vld [vmem:[%s4830_s1 + $0x28] sm:$0x3] (!%p338_p2)  ;;  %vm406_vm3 = vcmask (!%p338_p2), 138248   ;;  %v2957_v19 = vld [vmem:[%s4830_s1 + $0x40] sm:$0x3] (!%p338_p2) }
   0x9   : > { %3773 = vmatpush3.bf16.msra.mxu0 (!%p338_p2), %v3770_v4  ;;  %3767 = vmatprep.subr.bf16.mxu1 (!%p338_p2), %v3766_v9  ;;  %v3774_v11 = vpack.c.bf16 (!%p338_p2), %v2956_v8, %v2955_v7  ;;  %v2961_v20 = vld [vmem:[%s4830_s1 + $0x48] sm:$0xff] (!%p338_p2)  ;;  %v2962_v21 = vld [vmem:[%s4830_s1 + $0x50] sm:$0xff] (!%p338_p2)  ;;  %v2963_v26 = vld [vmem:[%s4830_s1 + $0x58] sm:$0x3] (!%p338_p2)  ;;  %vm388_vm4 = vcmask (!%p338_p2), 719872   ;;  %vm390_vm5 = vcmask (!%p338_p2), 714752  }
   0xa   : > { %3359 = vmatprep.subr.msk.mxu0 (!%p338_p2), %vm426_vm2, %v413_v6  ;;  %3769 = vmatpush3.bf16.msra.mxu1 (!%p338_p2), %v3766_v9  ;;  %v3778_v24 = vpack.c.bf16 (!%p338_p2), %v2962_v21, %v2961_v20  ;;  %v2967_v27 = vld [vmem:[%s4830_s1 + $0x60] sm:$0xff] (!%p338_p2)  ;;  %v2968_v28 = vld [vmem:[%s4830_s1 + $0x68] sm:$0xff] (!%p338_p2)  ;;  %v2969_v31 = vld [vmem:[%s4830_s1 + $0x70] sm:$0x3] (!%p338_p2)  ;;  %v4042_v5 = vmov (!%p338_p2), 0.0|0.0   ;;  %389 = vst.msk [vmem:[#allocation3] sm:$0xff] (!%p338_p2), %vm388_vm4, %v4040_v1 }
   0xb   : > { %3350 = vmatprep.subr.msk.mxu1 (!%p338_p2), %vm426_vm2, %v2948_v12  ;;  %v3782_v30 = vpack.c.bf16 (!%p338_p2), %v2968_v28, %v2967_v27  ;;  %v2973_v33 = vld [vmem:[%s4830_s1 + $0x78] sm:$0xff] (!%p338_p2)  ;;  %v2974_v34 = vld [vmem:[%s4830_s1 + $0x80] sm:$0xff] (!%p338_p2)  ;;  %v2975_v37 = vld [vmem:[%s4830_s1 + $0x88] sm:$0x3] (!%p338_p2)  ;;  %391 = vst.msk [vmem:[#allocation3 + $0x8] sm:$0x7] (!%p338_p2), %vm390_vm5, %v4040_v1 }
   0xc   : > { %v3786_v36 = vpack.c.bf16 (!%p338_p2), %v2974_v34, %v2973_v33  ;;  %v2979_v39 = vld [vmem:[%s4830_s1 + $0x90] sm:$0xff] (!%p338_p2)  ;;  %v2980_v40 = vld [vmem:[%s4830_s1 + $0x98] sm:$0xff] (!%p338_p2)  ;;  %v2981_v43 = vld [vmem:[%s4830_s1 + $0xa0] sm:$0x3] (!%p338_p2)  ;;  %vm4043_vm6 = vmmov (!%p338_p2), 0   ;;  %s4044_s28 = smov (!%p338_p2), 8  }
   0xd   : > { %s4842_s18 = smov (!%p375_p3, %s2939_s18), 3  ;;  %3360 = vmatpush3.msk.msra.mxu0 %vm426_vm2, %v413_v6  ;;  %v3790_v42 = vpack.c.bf16 %v2980_v40, %v2979_v39  ;;  %v2985_v45 = vld [vmem:[%s4830_s1 + $0xa8] sm:$0xff]  ;;  %v2986_v46 = vld [vmem:[%s4830_s1 + $0xb0] sm:$0xff]  ;;  %v2987_v49 = vld [vmem:[%s4830_s1 + $0xb8] sm:$0x3]  ;;  %vm1344_vm7 = vcmask 654400  }
   0xe   : > { %s3139_s14 = sshll.u32 %s4842_s18, 4  ;;  %3775 = vmatprep.subr.bf16.mxu0 %v3774_v11  ;;  %3351 = vmatpush3.msk.msra.mxu1 %vm426_vm2, %v2948_v12  ;;  %v3794_v48 = vpack.c.bf16 %v2986_v46, %v2985_v45  ;;  %v2991_v51 = vld [vmem:[%s4830_s1 + $0xc0] sm:$0xff]  ;;  %v2992_v52 = vld [vmem:[%s4830_s1 + $0xc8] sm:$0xff]  ;;  %v2993_v55 = vld [vmem:[%s4830_s1 + $0xd0] sm:$0x3]  ;;  %vm1346_vm8 = vcmask 647232   ;;  %s382_s27 = scalar_lea.vmem %s4840_s11, %s4842_s18 }
   0xf   : > { %s379_s19 = scalar_lea.vmem %s4829_s0, %s3139_s14  ;;  %v3798_v54 = vpack.c.bf16 %v2992_v52, %v2991_v51  ;;  %v2997_v57 = vld [vmem:[%s4830_s1 + $0xd8] sm:$0xff]  ;;  %v2998_v58 = vld [vmem:[%s4830_s1 + $0xe0] sm:$0xff]  ;;  %v2999_v62 = vld [vmem:[%s4830_s1 + $0xe8] sm:$0x3]  ;;  %3806 = vmatprep.subr.bf16.mxu1 %v4042_v5  ;;  %vm392_vm9 = vcmask 456704   ;;  %vm1967_vm10 = vcmask 389184  }
  0x10   : > { %v396_v10 = vld [vmem:[%s379_s19] sm:$0xff]  ;;  %v397_v13 = vld [vmem:[%s379_s19 + $0x8] sm:$0xff]  ;;  %v3802_v60 = vpack.c.bf16 %v2998_v58, %v2997_v57  ;;  %v1234_v0 = vld [vmem:[#allocation2 + $0x11] sm:$0x1]  ;;  %393 = vst.msk [vmem:[#allocation4] sm:$0x7f] %vm392_vm9, %v4040_v1 }
  0x11   : > { %400 = vrot.lane.b32.xlu0 %v396_v10, %s4041_s22  ;;  %v3004_v2 = vld [vmem:[%s4831_s2 + $0x58] sm:$0xff]  ;;  %v3005_v3 = vld [vmem:[%s4831_s2 + $0x60] sm:$0xff]  ;;  %v3029_v4 = vld [vmem:[%s4831_s2 + $0x108] sm:$0xff]  ;;  %vm1986_vm11 = vcmask 457728   ;;  %vm394_vm12 = vcmask 390144   ;;  %vm2312_vm13 = vcmask 322624  }
  0x12   : > { %v3807_v6 = vpack.c.bf16 %v3005_v3, %v3004_v2  ;;  %v3030_v7 = vld [vmem:[%s4831_s2 + $0x110] sm:$0xff]  ;;  %v3006_v8 = vld [vmem:[%s4831_s2 + $0x68] sm:$0xff]  ;;  %v3032_v12 = vld [vmem:[%s4831_s2 + $0x120] sm:$0xff]  ;;  %395 = vst.msk [vmem:[#allocation5] sm:$0x3f] %vm394_vm12, %v4040_v1  ;;  %vm2329_vm14 = vcmask 392192  }
  0x13   : > { %v3007_v9 = vld [vmem:[%s4831_s2 + $0x70] sm:$0xff]  ;;  %v3852_v10 = vpack.c.bf16 %v3030_v7, %v3029_v4  ;;  %v3010_v21 = vld [vmem:[%s4831_s2 + $0x88] sm:$0xff]  ;;  %v3003_v39 = vld [vmem:[%s4834_s5] ss:$0 sm:$0xff]  ;;  %vm2653_vm15 = vcmask 195584  }
  0x14   : > { %v3038_v33 = vld [vmem:[%s4831_s2 + $0x150] sm:$0xff]  ;;  %v3058_v2 = vld [vmem:[%s4831_s2 + $0x1e0] sm:$0xff]  ;;  %v1356_v7 = vld [vmem:[%s4831_s2 + $0x38] sm:$0xff] }
  0x15   : > { %402 = vrot.lane.b32.xlu0 %v397_v13, %s4041_s22  ;;  %v3810_v13 = vpack.c.bf16 %v3007_v9, %v3006_v8  ;;  %v3056_v57 = vld [vmem:[%s4831_s2 + $0x1d0] sm:$0xff]  ;;  %v3059_v8 = vld [vmem:[%s4831_s2 + $0x1e8] sm:$0xff] }
  0x16   : > { %v3060_v9 = vld [vmem:[%s4831_s2 + $0x1f0] sm:$0xff] }
  0x83   : > { %v401_v14 = vpop.permute.xlu0 %400 }
  0x84   : > { %407 = vst.msk [vmem:[#allocation2 + $0x1] sm:$0xff] %vm406_vm3, %v401_v14 }
  0x87   : > { %v403_v15 = vpop.permute.xlu0 %402 }
  0x88   : > { %408 = vst.msk [vmem:[#allocation2 + $0x9] sm:$0xff] %vm406_vm3, %v403_v15  ;;  %v3008_v15 = vld [vmem:[%s4831_s2 + $0x78] sm:$0xff] }
  0x8b   : > { %v414_v16 = vld [vmem:[#allocation2 + $0x1] sm:$0xff] }
  0x8c   : > { %v409_v17 = vld [vmem:[#allocation2] sm:$0xff]  ;;  %v410_v18 = vld [vmem:[#allocation2 + $0x8] sm:$0x1]  ;;  %3352 = vmatprep.mubr.msk.f32.mxu1 %vm383_vm0, %v414_v16 }
  0x8d   : > { %3361 = vmatprep.mubr.msk.f32.mxu0 %vm383_vm0, %v409_v17  ;;  %v3009_v16 = vld [vmem:[%s4831_s2 + $0x80] sm:$0xff]  ;;  %v3033_v17 = vld [vmem:[%s4831_s2 + $0x128] sm:$0xff] }
  0x8e   : > { %3362 = vmatmul.mubr.msk.f32.vlgmr.msra.gmra.mrb[0].mxu0 %vm383_vm0, %v410_v18  ;;  %v3034_v18 = vld [vmem:[%s4831_s2 + $0x130] sm:$0xff] }
  0x8f   : > { %3777 = vmatpush3.bf16.msra.mxu0 %v3774_v11  ;;  %v589_v22 = vld [vmem:[#allocation2 + $0x2] sm:$0xff]  ;;  %v590_v25 = vld [vmem:[#allocation2 + $0xa] sm:$0x1]  ;;  %v682_v32 = vld [vmem:[#allocation2 + $0xb] sm:$0x1]  ;;  %v3858_v20 = vpack.c.bf16 %v3034_v18, %v3033_v17 }
  0x90   : > { %3368 = vmatprep.subr.msk.mxu0 %vm426_vm2, %v2957_v19  ;;  %v415_v23 = vld [vmem:[#allocation2 + $0x9] sm:$0x1]  ;;  %3370 = vmatprep.mubr.msk.f32.mxu0 %vm383_vm0, %v589_v22  ;;  %v774_v38 = vld [vmem:[#allocation2 + $0xc] sm:$0x1]  ;;  %v866_v44 = vld [vmem:[#allocation2 + $0xd] sm:$0x1] }
  0x91   : > { %3353 = vmatmul.mubr.msk.f32.vlgmr.msra.gmra.mrb[0].mxu1 %vm383_vm0, %v415_v23  ;;  %v681_v29 = vld [vmem:[#allocation2 + $0x3] sm:$0xff]  ;;  %v958_v50 = vld [vmem:[#allocation2 + $0xe] sm:$0x1]  ;;  %v1050_v56 = vld [vmem:[#allocation2 + $0xf] sm:$0x1] }
  0x92   : > { %v773_v35 = vld [vmem:[#allocation2 + $0x4] sm:$0xff]  ;;  %v1142_v61 = vld [vmem:[#allocation2 + $0x10] sm:$0x1]  ;;  %v3031_v11 = vld [vmem:[%s4831_s2 + $0x118] sm:$0xff]  ;;  %3808 = vmatpush3.bf16.msra.mxu1 %v3807_v6  ;;  %3458 = vmatprep.mubr.msk.f32.mxu1 %vm4043_vm6, %v4040_v1 }
  0x93   : > { %3369 = vmatpush3.msk.msra.mxu0 %vm426_vm2, %v2957_v19  ;;  %v865_v41 = vld [vmem:[#allocation2 + $0x5] sm:$0xff]  ;;  %3809 = vmatprep.subr.bf16.mxu1 %v4042_v5  ;;  %v3855_v14 = vpack.c.bf16 %v3032_v12, %v3031_v11  ;;  %v3813_v19 = vpack.c.bf16 %v3009_v16, %v3008_v15  ;;  %v3011_v22 = vld [vmem:[%s4831_s2 + $0x90] sm:$0xff]  ;;  %v3035_v23 = vld [vmem:[%s4831_s2 + $0x138] sm:$0xff]  ;;  %v3891_v11 = vpack.c.bf16 %v3060_v9, %v3059_v8 }
  0x94   : > { %3779 = vmatprep.subr.bf16.mxu0 %v3778_v24  ;;  %v957_v47 = vld [vmem:[#allocation2 + $0x6] sm:$0xff]  ;;  %v1355_v6 = vld [vmem:[%s4831_s2 + $0x30] sm:$0xff] }
  0x95   : > { %v1049_v53 = vld [vmem:[#allocation2 + $0x7] sm:$0xff]  ;;  %v3017_v18 = vld [vmem:[%s4831_s2 + $0xb0] sm:$0xff] }
  0x96   : > { %3371 = vmatmul.mubr.msk.f32.vlgmr.msra.gmra.mrb[0].mxu0 %vm383_vm0, %v590_v25  ;;  %v1141_v59 = vld [vmem:[#allocation2 + $0x8] sm:$0xff]  ;;  %3811 = vmatpush3.bf16.msra.mxu1 %v3810_v13  ;;  %v3816_v25 = vpack.c.bf16 %v3011_v22, %v3010_v21  ;;  %v1357_v12 = vld [vmem:[%s4831_s2 + $0x40] sm:$0xff] }
  0x97   : > { %3781 = vmatpush3.bf16.msra.mxu0 %v3778_v24  ;;  %3379 = vmatprep.mubr.msk.f32.mxu0 %vm383_vm0, %v681_v29  ;;  %v1233_v63 = vld [vmem:[#allocation2 + $0x9] sm:$0xff]  ;;  %v3036_v24 = vld [vmem:[%s4831_s2 + $0x140] sm:$0xff]  ;;  %v3012_v29 = vld [vmem:[%s4831_s2 + $0x98] sm:$0xff] }
  0x98   : > { %3377 = vmatprep.subr.msk.mxu0 %vm426_vm2, %v2963_v26  ;;  %3812 = vmatprep.subr.bf16.mxu1 %v4042_v5  ;;  %v1358_v13 = vld [vmem:[%s4831_s2 + $0x48] sm:$0xff]  ;;  %v3062_v15 = vld [vmem:[%s4831_s2 + $0x200] sm:$0xff] }
  0x99   : > { %v3834_v16 = vpack.c.bf16 %v1358_v13, %v1357_v12  ;;  %v3063_v21 = vld [vmem:[%s4831_s2 + $0x208] sm:$0xff]  ;;  %v3075_v9 = vld [vmem:[%s4831_s2 + $0x260] sm:$0xff] }
  0x9a   : > { %3814 = vmatpush3.bf16.msra.mxu1 %v3813_v19  ;;  %v3018_v19 = vld [vmem:[%s4831_s2 + $0xb8] sm:$0xff]  ;;  %v3079_v12 = vld [vmem:[%s4832_s3 + $0x40] sm:$0xff] }
  0x9b   : > { %3378 = vmatpush3.msk.msra.mxu0 %vm426_vm2, %v2963_v26  ;;  %3815 = vmatprep.subr.bf16.mxu1 %v4042_v5  ;;  %v3861_v26 = vpack.c.bf16 %v3036_v24, %v3035_v23  ;;  %v3837_v22 = vpack.c.bf16 %v3018_v19, %v3017_v18  ;;  %v3019_v23 = vld [vmem:[%s4831_s2 + $0xc0] sm:$0xff]  ;;  %v3020_v24 = vld [vmem:[%s4831_s2 + $0xc8] sm:$0xff]  ;;  %v1972_v19 = vld [vmem:[%s4832_s3 + $0x10] sm:$0xff] }
  0x9c   : > { %3783 = vmatprep.subr.bf16.mxu0 %v3782_v30  ;;  %v1970_v13 = vld [vmem:[%s4832_s3] sm:$0xff] }
  0x9e   : > { %3380 = vmatmul.mubr.msk.f32.vlgmr.msra.gmra.mrb[0].mxu0 %vm383_vm0, %v682_v32  ;;  %3817 = vmatpush3.bf16.msra.mxu1 %v3816_v25 }
  0x9f   : > { %3785 = vmatpush3.bf16.msra.mxu0 %v3782_v30  ;;  %3388 = vmatprep.mubr.msk.f32.mxu0 %vm383_vm0, %v773_v35  ;;  %v3013_v30 = vld [vmem:[%s4831_s2 + $0xa0] sm:$0xff]  ;;  %v3014_v35 = vld [vmem:[%s4831_s2 + $0xa8] sm:$0xff] }
  0xa0   : > { %3386 = vmatprep.subr.msk.mxu0 %vm426_vm2, %v2969_v31  ;;  %3818 = vmatprep.subr.bf16.mxu1 %v4042_v5  ;;  %v3819_v32 = vpack.c.bf16 %v3013_v30, %v3012_v29  ;;  %v3022_v29 = vld [vmem:[%s4831_s2 + $0xd8] sm:$0xff] }
  0xa2   : > { %3820 = vmatpush3.bf16.msra.mxu1 %v3819_v32  ;;  %v3024_v32 = vld [vmem:[%s4831_s2 + $0xe8] sm:$0xff] }
  0xa3   : > { %3387 = vmatpush3.msk.msra.mxu0 %vm426_vm2, %v2969_v31  ;;  %v3037_v31 = vld [vmem:[%s4831_s2 + $0x148] sm:$0xff]  ;;  %3456 = vmatprep.subr.mxu1 %v4040_v1 }
  0xa4   : > { %3787 = vmatprep.subr.bf16.mxu0 %v3786_v36  ;;  %v3864_v34 = vpack.c.bf16 %v3038_v33, %v3037_v31  ;;  %v3023_v31 = vld [vmem:[%s4831_s2 + $0xe0] sm:$0xff] }
  0xa5   : > { %v3846_v33 = vpack.c.bf16 %v3024_v32, %v3023_v31 }
  0xa6   : > { %3389 = vmatmul.mubr.msk.f32.vlgmr.msra.gmra.mrb[0].mxu0 %vm383_vm0, %v774_v38  ;;  %3457 = vmatpush3.msra.mxu1 %v3014_v35  ;;  %v3026_v35 = vld [vmem:[%s4831_s2 + $0xf8] sm:$0xff] }
  0xa7   : > { %3789 = vmatpush3.bf16.msra.mxu0 %v3786_v36  ;;  %3397 = vmatprep.mubr.msk.f32.mxu0 %vm383_vm0, %v865_v41 }
  0xa8   : > { %3395 = vmatprep.subr.msk.mxu0 %vm426_vm2, %v2975_v37  ;;  %3821 = vmatprep.subr.bf16.mxu1 %v4042_v5 }
  0xab   : > { %3396 = vmatpush3.msk.msra.mxu0 %vm426_vm2, %v2975_v37  ;;  %v3039_v37 = vld [vmem:[%s4831_s2 + $0x158] sm:$0xff] }
  0xac   : > { %3791 = vmatprep.subr.bf16.mxu0 %v3790_v42 }
  0xae   : > { %3398 = vmatmul.mubr.msk.f32.vlgmr.msra.gmra.mrb[0].mxu0 %vm383_vm0, %v866_v44 }
  0xaf   : > { %3793 = vmatpush3.bf16.msra.mxu0 %v3790_v42  ;;  %3406 = vmatprep.mubr.msk.f32.mxu0 %vm383_vm0, %v957_v47  ;;  %v1349_v47 = vld [vmem:[%s4831_s2] sm:$0xff] }
  0xb0   : > { %3404 = vmatprep.subr.msk.mxu0 %vm426_vm2, %v2981_v43 }
  0xb3   : > { %3405 = vmatpush3.msk.msra.mxu0 %vm426_vm2, %v2981_v43 }
  0xb4   : > { %3795 = vmatprep.subr.bf16.mxu0 %v3794_v48 }
  0xb6   : > { %3407 = vmatmul.mubr.msk.f32.vlgmr.msra.gmra.mrb[0].mxu0 %vm383_vm0, %v958_v50  ;;  %v3054_v50 = vld [vmem:[%s4831_s2 + $0x1c0] sm:$0xff] }
  0xb7   : > { %3797 = vmatpush3.bf16.msra.mxu0 %v3794_v48  ;;  %3415 = vmatprep.mubr.msk.f32.mxu0 %vm383_vm0, %v1049_v53  ;;  %v1350_v48 = vld [vmem:[%s4831_s2 + $0x8] sm:$0xff] }
  0xb8   : > { %3413 = vmatprep.subr.msk.mxu0 %vm426_vm2, %v2987_v49  ;;  %v3822_v52 = vpack.c.bf16 %v1350_v48, %v1349_v47  ;;  %v3047_v48 = vld [vmem:[%s4831_s2 + $0x190] sm:$0xff] }
  0xbb   : > { %3414 = vmatpush3.msk.msra.mxu0 %vm426_vm2, %v2987_v49  ;;  %v3053_v49 = vld [vmem:[%s4831_s2 + $0x1b8] sm:$0xff] }
  0xbc   : > { %3799 = vmatprep.subr.bf16.mxu0 %v3798_v54  ;;  %v3882_v53 = vpack.c.bf16 %v3054_v50, %v3053_v49  ;;  %v3048_v49 = vld [vmem:[%s4831_s2 + $0x198] sm:$0xff] }
  0xbd   : > { %v3876_v50 = vpack.c.bf16 %v3048_v49, %v3047_v48  ;;  %v3077_v49 = vld [vmem:[%s4835_s6] ss:$0 sm:$0xff] }
  0xbe   : > { %3416 = vmatmul.mubr.msk.f32.vlgmr.msra.gmra.mrb[0].mxu0 %vm383_vm0, %v1050_v56  ;;  %v3055_v56 = vld [vmem:[%s4831_s2 + $0x1c8] sm:$0xff] }
  0xbf   : > { %3801 = vmatpush3.bf16.msra.mxu0 %v3798_v54  ;;  %3424 = vmatprep.mubr.msk.f32.mxu0 %vm383_vm0, %v1141_v59  ;;  %v1351_v54 = vld [vmem:[%s4831_s2 + $0x10] sm:$0xff] }
  0xc0   : > { %3422 = vmatprep.subr.msk.mxu0 %vm426_vm2, %v2993_v55 }
  0xc3   : > { %3423 = vmatpush3.msk.msra.mxu0 %vm426_vm2, %v2993_v55  ;;  %v1352_v55 = vld [vmem:[%s4831_s2 + $0x18] sm:$0xff] }
  0xc4   : > { %3803 = vmatprep.subr.bf16.mxu0 %v3802_v60 }
  0xc6   : > { %3425 = vmatmul.mubr.msk.f32.vlgmr.msra.gmra.mrb[0].mxu0 %vm383_vm0, %v1142_v61  ;;  %v3885_v61 = vpack.c.bf16 %v3056_v57, %v3055_v56  ;;  %v3051_v56 = vld [vmem:[%s4831_s2 + $0x1b0] sm:$0xff] }
  0xc7   : > { %3805 = vmatpush3.bf16.msra.mxu0 %v3802_v60  ;;  %3433 = vmatprep.mubr.msk.f32.mxu0 %vm383_vm0, %v1233_v63  ;;  %v3825_v60 = vpack.c.bf16 %v1352_v55, %v1351_v54  ;;  %v1354_v63 = vld [vmem:[%s4831_s2 + $0x28] sm:$0xff]  ;;  %v3065_v54 = vld [vmem:[%s4831_s2 + $0x210] sm:$0xff]  ;;  %v3066_v55 = vld [vmem:[%s4831_s2 + $0x218] sm:$0xff] }
  0xc8   : > { %3431 = vmatprep.subr.msk.mxu0 %vm426_vm2, %v2999_v62  ;;  %v3897_v57 = vpack.c.bf16 %v3066_v55, %v3065_v54  ;;  %v3087_v55 = vld [vmem:[%s4832_s3 + $0x70] sm:$0xff] }
  0xcb   : > { %3432 = vmatpush3.msk.msra.mxu0 %vm426_vm2, %v2999_v62  ;;  %v1353_v62 = vld [vmem:[%s4831_s2 + $0x20] sm:$0xff] }
  0xcc   : > { %3851 = vmatprep.subr.bf16.mxu0 %v4042_v5  ;;  %v3828_v3 = vpack.c.bf16 %v1354_v63, %v1353_v62  ;;  %v3069_v62 = vld [vmem:[%s4831_s2 + $0x230] sm:$0xff]  ;;  %v3070_v63 = vld [vmem:[%s4831_s2 + $0x238] sm:$0xff] }
  0xce   : > { %3434 = vmatmul.mubr.msk.f32.vlgmr.msra.gmra.mrb[0].mxu0 %vm383_vm0, %v1234_v0  ;;  %v3057_v0 = vld [vmem:[%s4831_s2 + $0x1d8] sm:$0xff]  ;;  %vm2890_vm0 = vcmask 253952  }
  0xcf   : > { %3853 = vmatpush3.bf16.msra.mxu0 %v3852_v10  ;;  %3533 = vmatprep.mubr.msk.f32.mxu0 %vm4043_vm6, %v4040_v1  ;;  %v3888_v4 = vpack.c.bf16 %v3058_v2, %v3057_v0  ;;  %v3831_v10 = vpack.c.bf16 %v1356_v7, %v1355_v6  ;;  %v3903_v0 = vpack.c.bf16 %v3070_v63, %v3069_v62  ;;  %v3071_v2 = vld [vmem:[%s4831_s2 + $0x240] sm:$0xff]  ;;  %v3073_v6 = vld [vmem:[%s4831_s2 + $0x250] sm:$0xff]  ;;  %v3074_v7 = vld [vmem:[%s4831_s2 + $0x258] sm:$0xff] }
  0xd0   : > { %3854 = vmatprep.subr.bf16.mxu0 %v4042_v5  ;;  %v3909_v8 = vpack.c.bf16 %v3074_v7, %v3073_v6  ;;  %v3090_v62 = vld [vmem:[%s4832_s3 + $0x88] sm:$0xff]  ;;  %v3097_v63 = vld [vmem:[%s4832_s3 + $0xb8] sm:$0xff]  ;;  %v3091_v7 = vld [vmem:[%s4832_s3 + $0x90] sm:$0xff] }
  0xd3   : > { %3856 = vmatpush3.bf16.msra.mxu0 %v3855_v14  ;;  %v3061_v14 = vld [vmem:[%s4831_s2 + $0x1f8] sm:$0xff] }
  0xd4   : > { %3857 = vmatprep.subr.bf16.mxu0 %v4042_v5  ;;  %v3894_v17 = vpack.c.bf16 %v3062_v15, %v3061_v14  ;;  %v1971_v15 = vld [vmem:[%s4832_s3 + $0x8] sm:$0xff] }
  0xd5   : > { %v3921_v18 = vpack.c.bf16 %v1971_v15, %v1970_v13  ;;  %v3093_v13 = vld [vmem:[%s4832_s3 + $0xa0] sm:$0xff] }
  0xd7   : > { %3859 = vmatpush3.bf16.msra.mxu0 %v3858_v20  ;;  %v1359_v20 = vld [vmem:[%s4831_s2 + $0x50] sm:$0xff] }
  0xd8   : > { %3860 = vmatprep.subr.bf16.mxu0 %v4042_v5 }
  0xdb   : > { %3862 = vmatpush3.bf16.msra.mxu0 %v3861_v26 }
  0xdc   : > { %3863 = vmatprep.subr.bf16.mxu0 %v4042_v5 }
  0xdf   : > { %3865 = vmatpush3.bf16.msra.mxu0 %v3864_v34  ;;  %v3025_v34 = vld [vmem:[%s4831_s2 + $0xf0] sm:$0xff] }
  0xe0   : > { %3531 = vmatprep.subr.mxu0 %v4040_v1 }
  0xe3   : > { %3532 = vmatpush3.msra.mxu0 %v3039_v37  ;;  %v3041_v37 = vld [vmem:[%s4831_s2 + $0x160] sm:$0xff] }
  0xe4   : > { %3881 = vmatprep.subr.bf16.mxu0 %v4042_v5 }
 0x164   : > { %v3354_v27 = vpop.f32.mrb[0].mxu1 }
 0x165   : > { %v496_v28 = vpop.f32.mrb[1].mxu1 }
 0x1a1   : > { %v3435_v36 = vpop.f32.mrb[0].mxu0 }
 0x1a2   : > { %v3992_v38 = vadd.f32 %v3435_v36, %v3354_v27  ;;  %v1314_v40 = vpop.f32.mrb[1].mxu0  ;;  %v3840_v27 = vpack.c.bf16 %v3020_v24, %v3019_v23  ;;  %v3849_v36 = vpack.c.bf16 %v3026_v35, %v3025_v34 }
 0x1a3   : > { %v3993_v41 = vadd.f32 %v1314_v40, %v496_v28  ;;  %v3021_v28 = vld [vmem:[%s4831_s2 + $0xd0] sm:$0xff] }
 0x1a4   : > { %v1333_v43 = vadd.f32 %v3992_v38, %v3003_v39  ;;  %v3843_v30 = vpack.c.bf16 %v3022_v29, %v3021_v28  ;;  %v3042_v38 = vld [vmem:[%s4831_s2 + $0x168] sm:$0xff] }
 0x1a5   : > { %v1332_v42 = vadd.f32 %v3993_v41, %v3003_v39  ;;  %v3027_v39 = vld [vmem:[%s4831_s2 + $0x100] sm:$0xff]  ;;  %v3867_v40 = vpack.c.bf16 %v3042_v38, %v3041_v37  ;;  %v3043_v41 = vld [vmem:[%s4831_s2 + $0x170] sm:$0xff] }
 0x1a6   : > { %v1335_v45 = vmax.f32 %v1333_v43, 0.0 }
 0x1a7   : > { %v1334_v44 = vmax.f32 %v1332_v42, 0.0  ;;  %v3044_v42 = vld [vmem:[%s4831_s2 + $0x178] sm:$0xff] }
 0x1a9   : > { %1338 = vrot.lane.b32.xlu1 %v1334_v44, %s4044_s28  ;;  %v3870_v44 = vpack.c.bf16 %v3044_v42, %v3043_v41  ;;  %v3083_v41 = vld [vmem:[%s4832_s3 + $0x60] sm:$0xff] }
 0x1aa   : > { %v1974_v42 = vld [vmem:[%s4832_s3 + $0x20] sm:$0xff] }
 0x1ad   : > { %1340 = vrot.lane.b32.xlu1 %v1335_v45, %s4044_s28  ;;  %v3045_v45 = vld [vmem:[%s4831_s2 + $0x180] sm:$0xff] }
 0x21b   : > { %v1339_v46 = vpop.permute.xlu1 %1338 }
 0x21c   : > { %1345 = vst.msk [vmem:[#allocation3 + $0x1] sm:$0xff] %vm1344_vm7, %v1339_v46  ;;  %v3046_v46 = vld [vmem:[%s4831_s2 + $0x188] sm:$0xff] }
 0x21d   : > { %v3873_v47 = vpack.c.bf16 %v3046_v46, %v3045_v45  ;;  %v3084_v46 = vld [vmem:[%s4832_s3 + $0x68] sm:$0xff] }
 0x21f   : > { %v1341_v51 = vpop.permute.xlu1 %1340 }
 0x220   : > { %1347 = vst.msk [vmem:[#allocation3 + $0x9] sm:$0x1] %vm1346_vm8, %v1341_v51  ;;  %v3049_v51 = vld [vmem:[%s4831_s2 + $0x1a0] sm:$0xff] }
 0x223   : > { %v1360_v58 = vld [vmem:[#allocation3 + $0x1] sm:$0x1f] }
 0x224   : > { %v1606_v59 = vld [vmem:[#allocation3 + $0x3] sm:$0x1f]  ;;  %3459 = vmatmul.mubr.msk.f32.vlgmr.msra.gmra.mrb[2].mxu1 %vm388_vm4, %v1360_v58  ;;  %v3067_v58 = vld [vmem:[%s4831_s2 + $0x220] sm:$0xff] }
 0x225   : > { %3534 = vmatmul.mubr.msk.f32.vlgmr.msra.gmra.mrb[2].mxu0 %vm388_vm4, %v1606_v59  ;;  %3823 = vmatpush3.bf16.msra.mxu1 %v3822_v52  ;;  %v1348_v25 = vld [vmem:[#allocation3] sm:$0x1f]  ;;  %v3050_v52 = vld [vmem:[%s4831_s2 + $0x1a8] sm:$0xff] }
 0x226   : > { %3883 = vmatpush3.bf16.msra.mxu0 %v3882_v53  ;;  %3824 = vmatprep.subr.bf16.mxu1 %v4042_v5  ;;  %v1519_v43 = vld [vmem:[#allocation3 + $0x2] sm:$0x1f]  ;;  %v3879_v53 = vpack.c.bf16 %v3050_v52, %v3049_v51  ;;  %v3068_v59 = vld [vmem:[%s4831_s2 + $0x228] sm:$0xff] }
 0x227   : > { %3884 = vmatprep.subr.bf16.mxu0 %v4042_v5  ;;  %3483 = vmatprep.mubr.msk.f32.mxu1 %vm4043_vm6, %v4040_v1  ;;  %v1780_v26 = vld [vmem:[#allocation3 + $0x5] sm:$0x1f] }
 0x228   : > { %3583 = vmatprep.mubr.msk.f32.mxu0 %vm4043_vm6, %v4040_v1 }
 0x229   : > { %3826 = vmatpush3.bf16.msra.mxu1 %v3825_v60  ;;  %v1693_v60 = vld [vmem:[#allocation3 + $0x4] sm:$0x1f] }
 0x22a   : > { %3886 = vmatpush3.bf16.msra.mxu0 %v3885_v61  ;;  %3827 = vmatprep.subr.bf16.mxu1 %v4042_v5  ;;  %v3900_v61 = vpack.c.bf16 %v3068_v59, %v3067_v58  ;;  %v3096_v58 = vld [vmem:[%s4832_s3 + $0xb0] sm:$0xff] }
 0x22b   : > { %3887 = vmatprep.subr.bf16.mxu0 %v4042_v5 }
 0x22d   : > { %3829 = vmatpush3.bf16.msra.mxu1 %v3828_v3  ;;  %v3072_v3 = vld [vmem:[%s4831_s2 + $0x248] sm:$0xff] }
 0x22e   : > { %3889 = vmatpush3.bf16.msra.mxu0 %v3888_v4  ;;  %3830 = vmatprep.subr.bf16.mxu1 %v4042_v5  ;;  %v3906_v4 = vpack.c.bf16 %v3072_v3, %v3071_v2 }
 0x22f   : > { %3890 = vmatprep.subr.bf16.mxu0 %v4042_v5 }
 0x231   : > { %3832 = vmatpush3.bf16.msra.mxu1 %v3831_v10  ;;  %v1867_v10 = vld [vmem:[#allocation3 + $0x6] sm:$0x1f] }
 0x232   : > { %3892 = vmatpush3.bf16.msra.mxu0 %v3891_v11  ;;  %3833 = vmatprep.subr.bf16.mxu1 %v4042_v5  ;;  %v3078_v11 = vld [vmem:[%s4832_s3 + $0x38] sm:$0xff] }
 0x233   : > { %3893 = vmatprep.subr.bf16.mxu0 %v4042_v5  ;;  %v3912_v14 = vpack.c.bf16 %v3079_v12, %v3078_v11 }
 0x235   : > { %3835 = vmatpush3.bf16.msra.mxu1 %v3834_v16  ;;  %v3080_v16 = vld [vmem:[%s4832_s3 + $0x48] sm:$0xff] }
 0x236   : > { %3895 = vmatpush3.bf16.msra.mxu0 %v3894_v17  ;;  %3481 = vmatprep.subr.mxu1 %v4040_v1  ;;  %v3081_v17 = vld [vmem:[%s4832_s3 + $0x50] sm:$0xff] }
 0x237   : > { %3581 = vmatprep.subr.mxu0 %v4040_v1 }
 0x239   : > { %3482 = vmatpush3.msra.mxu1 %v1359_v20  ;;  %v1973_v20 = vld [vmem:[%s4832_s3 + $0x18] sm:$0xff] }
 0x23a   : > { %3582 = vmatpush3.msra.mxu0 %v3063_v21  ;;  %3484 = vmatmul.mubr.msk.f32.vlgmr.msra.gmra.mrb[4].mxu1 %vm388_vm4, %v1348_v25  ;;  %v3915_v21 = vpack.c.bf16 %v3081_v17, %v3080_v16  ;;  %v3104_v17 = vld [vmem:[%s4833_s4 + $0x30] sm:$0xff] }
 0x23b   : > { %3836 = vmatprep.subr.bf16.mxu1 %v4042_v5  ;;  %3584 = vmatmul.mubr.msk.f32.vlgmr.msra.gmra.mrb[4].mxu0 %vm388_vm4, %v1780_v26 }
 0x23c   : > { %3838 = vmatpush3.bf16.msra.mxu1 %v3837_v22  ;;  %3508 = vmatprep.mubr.msk.f32.mxu1 %vm4043_vm6, %v4040_v1  ;;  %v3924_v22 = vpack.c.bf16 %v1973_v20, %v1972_v19  ;;  %v2315_v19 = vld [vmem:[%s4833_s4] sm:$0xff] }
 0x23d   : > { %3839 = vmatprep.subr.bf16.mxu1 %v4042_v5  ;;  %3911 = vmatprep.subr.bf16.mxu0 %v4042_v5 }
 0x23e   : > { %3625 = vmatprep.mubr.msk.f32.mxu0 %vm4043_vm6, %v4040_v1  ;;  %3913 = vmatpush3.bf16.msra.mxu0 %v3912_v14  ;;  %v3101_v14 = vld [vmem:[%s4832_s3 + $0xd8] sm:$0xff] }
 0x23f   : > { %3914 = vmatprep.subr.bf16.mxu0 %v4042_v5 }
 0x240   : > { %3841 = vmatpush3.bf16.msra.mxu1 %v3840_v27 }
 0x241   : > { %3842 = vmatprep.subr.bf16.mxu1 %v4042_v5 }
 0x242   : > { %3916 = vmatpush3.bf16.msra.mxu0 %v3915_v21  ;;  %v2316_v21 = vld [vmem:[%s4833_s4 + $0x8] sm:$0xff] }
 0x243   : > { %3917 = vmatprep.subr.bf16.mxu0 %v4042_v5 }
 0x244   : > { %3844 = vmatpush3.bf16.msra.mxu1 %v3843_v30 }
 0x245   : > { %3845 = vmatprep.subr.bf16.mxu1 %v4042_v5 }
 0x248   : > { %3847 = vmatpush3.bf16.msra.mxu1 %v3846_v33 }
 0x249   : > { %3848 = vmatprep.subr.bf16.mxu1 %v4042_v5 }
 0x24c   : > { %3850 = vmatpush3.bf16.msra.mxu1 %v3849_v36 }
 0x24d   : > { %3506 = vmatprep.subr.mxu1 %v4040_v1 }
 0x250   : > { %3507 = vmatpush3.msra.mxu1 %v3027_v39 }
 0x251   : > { %3509 = vmatmul.mubr.msk.f32.vlgmr.msra.gmra.mrb[6].mxu1 %vm388_vm4, %v1519_v43  ;;  %3866 = vmatprep.subr.bf16.mxu1 %v4042_v5 }
 0x252   : > { %3868 = vmatpush3.bf16.msra.mxu1 %v3867_v40  ;;  %3558 = vmatprep.mubr.msk.f32.mxu1 %vm4043_vm6, %v4040_v1  ;;  %v3082_v40 = vld [vmem:[%s4832_s3 + $0x58] sm:$0xff] }
 0x253   : > { %3869 = vmatprep.subr.bf16.mxu1 %v4042_v5  ;;  %v3918_v43 = vpack.c.bf16 %v3083_v41, %v3082_v40 }
 0x255   : > { %3919 = vmatpush3.bf16.msra.mxu0 %v3918_v43 }
 0x256   : > { %3871 = vmatpush3.bf16.msra.mxu1 %v3870_v44  ;;  %v1975_v44 = vld [vmem:[%s4832_s3 + $0x28] sm:$0xff]  ;;  %3623 = vmatprep.subr.mxu0 %v4040_v1 }
 0x257   : > { %3872 = vmatprep.subr.bf16.mxu1 %v4042_v5  ;;  %v3927_v45 = vpack.c.bf16 %v1975_v44, %v1974_v42 }
 0x259   : > { %3624 = vmatpush3.msra.mxu0 %v3084_v46 }
 0x25a   : > { %3874 = vmatpush3.bf16.msra.mxu1 %v3873_v47  ;;  %v1976_v47 = vld [vmem:[%s4832_s3 + $0x30] sm:$0xff]  ;;  %3929 = vmatprep.subr.bf16.mxu0 %v4042_v5 }
 0x25b   : > { %3875 = vmatprep.subr.bf16.mxu1 %v4042_v5 }
 0x25e   : > { %3877 = vmatpush3.bf16.msra.mxu1 %v3876_v50 }
 0x25f   : > { %3878 = vmatprep.subr.bf16.mxu1 %v4042_v5 }
 0x262   : > { %3880 = vmatpush3.bf16.msra.mxu1 %v3879_v53 }
 0x263   : > { %3556 = vmatprep.subr.mxu1 %v4040_v1 }
 0x266   : > { %3557 = vmatpush3.msra.mxu1 %v3051_v56  ;;  %v3088_v56 = vld [vmem:[%s4832_s3 + $0x78] sm:$0xff] }
 0x267   : > { %3559 = vmatmul.mubr.msk.f32.vlgmr.msra.gmra.mrb[8].mxu1 %vm388_vm4, %v1693_v60  ;;  %3896 = vmatprep.subr.bf16.mxu1 %v4042_v5  ;;  %v3930_v59 = vpack.c.bf16 %v3088_v56, %v3087_v55  ;;  %v3114_v56 = vld [vmem:[%s4833_s4 + $0x70] sm:$0xff] }
 0x268   : > { %3898 = vmatpush3.bf16.msra.mxu1 %v3897_v57  ;;  %3608 = vmatprep.mubr.msk.f32.mxu1 %vm4043_vm6, %v4040_v1  ;;  %v3095_v57 = vld [vmem:[%s4832_s3 + $0xa8] sm:$0xff] }
 0x269   : > { %3899 = vmatprep.subr.bf16.mxu1 %v4042_v5  ;;  %v3939_v60 = vpack.c.bf16 %v3096_v58, %v3095_v57  ;;  %v3115_v57 = vld [vmem:[%s4833_s4 + $0x78] sm:$0xff]  ;;  %v3121_v58 = vld [vmem:[%s4833_s4 + $0xa0] sm:$0xff] }
 0x26c   : > { %3901 = vmatpush3.bf16.msra.mxu1 %v3900_v61  ;;  %v3089_v61 = vld [vmem:[%s4832_s3 + $0x80] sm:$0xff] }
 0x26d   : > { %3902 = vmatprep.subr.bf16.mxu1 %v4042_v5 }
 0x270   : > { %3904 = vmatpush3.bf16.msra.mxu1 %v3903_v0  ;;  %v3098_v0 = vld [vmem:[%s4832_s3 + $0xc0] sm:$0xff] }
 0x271   : > { %3905 = vmatprep.subr.bf16.mxu1 %v4042_v5  ;;  %v3942_v6 = vpack.c.bf16 %v3098_v0, %v3097_v63  ;;  %v3116_v0 = vld [vmem:[%s4833_s4 + $0x80] sm:$0xff] }
 0x274   : > { %3907 = vmatpush3.bf16.msra.mxu1 %v3906_v4  ;;  %v3933_v4 = vpack.c.bf16 %v3090_v62, %v3089_v61  ;;  %v3969_v62 = vpack.c.bf16 %v3115_v57, %v3114_v56 }
 0x275   : > { %3908 = vmatprep.subr.bf16.mxu1 %v4042_v5 }
 0x278   : > { %3910 = vmatpush3.bf16.msra.mxu1 %v3909_v8  ;;  %v3092_v8 = vld [vmem:[%s4832_s3 + $0x98] sm:$0xff] }
 0x279   : > { %3606 = vmatprep.subr.mxu1 %v4040_v1  ;;  %v3936_v11 = vpack.c.bf16 %v3092_v8, %v3091_v7 }
 0x27c   : > { %3607 = vmatpush3.msra.mxu1 %v3075_v9  ;;  %v3099_v9 = vld [vmem:[%s4832_s3 + $0xc8] sm:$0xff] }
 0x27d   : > { %3609 = vmatmul.mubr.msk.f32.vlgmr.msra.gmra.mrb[10].mxu1 %vm388_vm4, %v1867_v10  ;;  %3920 = vmatprep.subr.bf16.mxu1 %v4042_v5  ;;  %v3100_v10 = vld [vmem:[%s4832_s3 + $0xd0] sm:$0xff] }
 0x27e   : > { %3642 = vmatprep.mubr.msk.f32.mxu1 %vm4043_vm6, %v4040_v1  ;;  %3922 = vmatpush3.bf16.msra.mxu1 %v3921_v18  ;;  %v3945_v12 = vpack.c.bf16 %v3100_v10, %v3099_v9  ;;  %v3105_v18 = vld [vmem:[%s4833_s4 + $0x38] sm:$0xff]  ;;  %v2650_v10 = vld [vmem:[%s4838_s9] sm:$0xff] }
 0x27f   : > { %3923 = vmatprep.subr.bf16.mxu1 %v4042_v5  ;;  %v3948_v20 = vpack.c.bf16 %v3105_v18, %v3104_v17 }
 0x282   : > { %3925 = vmatpush3.bf16.msra.mxu1 %v3924_v22  ;;  %v3957_v22 = vpack.c.bf16 %v2316_v21, %v2315_v19 }
 0x283   : > { %3926 = vmatprep.subr.bf16.mxu1 %v4042_v5 }
 0x286   : > { %3928 = vmatpush3.bf16.msra.mxu1 %v3927_v45  ;;  %v3103_v45 = vld [vmem:[%s4836_s7] ss:$0 sm:$0xff] }
 0x287   : > { %3640 = vmatprep.subr.mxu1 %v4040_v1 }
 0x28a   : > { %3641 = vmatpush3.msra.mxu1 %v1976_v47 }
 0x28b   : > { %3938 = vmatprep.subr.bf16.mxu1 %v4042_v5 }
 0x2f7   : > { %v1442_v23 = vpop.f32.mrb[2].mxu1 }
 0x2f8   : > { %v1688_v24 = vpop.f32.mrb[2].mxu0  ;;  %v3460_v25 = vpop.f32.mrb[3].mxu1 }
 0x2f9   : > { %v3535_v26 = vpop.f32.mrb[3].mxu0 }
 0x30d   : > { %v1515_v27 = vpop.f32.mrb[4].mxu1 }
 0x30e   : > { %v1516_v28 = vadd.f32 %v1515_v27, %v1442_v23  ;;  %v1862_v29 = vpop.f32.mrb[4].mxu0  ;;  %v3485_v30 = vpop.f32.mrb[5].mxu1 }
 0x30f   : > { %v3585_v31 = vpop.f32.mrb[5].mxu0  ;;  %v2317_v30 = vld [vmem:[%s4833_s4 + $0x10] sm:$0xff] }
 0x324   : > { %v1601_v32 = vpop.f32.mrb[6].mxu1 }
 0x325   : > { %v1605_v33 = vadd.f32 %v1601_v32, %v1516_v28  ;;  %v3510_v34 = vpop.f32.mrb[7].mxu1  ;;  %v3106_v28 = vld [vmem:[%s4833_s4 + $0x40] sm:$0xff]  ;;  %v2318_v32 = vld [vmem:[%s4833_s4 + $0x18] sm:$0xff] }
 0x326   : > { %v3109_v34 = vld [vmem:[%s4833_s4 + $0x58] sm:$0xff] }
 0x327   : > { %v1692_v35 = vadd.f32 %v1688_v24, %v1605_v33  ;;  %v3108_v33 = vld [vmem:[%s4833_s4 + $0x50] sm:$0xff] }
 0x33a   : > { %v1775_v36 = vpop.f32.mrb[8].mxu1 }
 0x33b   : > { %v1779_v37 = vadd.f32 %v1775_v36, %v1692_v35  ;;  %v3560_v38 = vpop.f32.mrb[9].mxu1  ;;  %v3960_v35 = vpack.c.bf16 %v2318_v32, %v2317_v30  ;;  %v2319_v36 = vld [vmem:[%s4833_s4 + $0x20] sm:$0xff]  ;;  %v3132_v32 = vld [vmem:[%s4838_s9 + $0x30] sm:$0xff] }
 0x33c   : > { %v3954_v38 = vpack.c.bf16 %v3109_v34, %v3108_v33  ;;  %v3133_v33 = vld [vmem:[%s4838_s9 + $0x38] sm:$0xff] }
 0x33d   : > { %v1866_v39 = vadd.f32 %v1862_v29, %v1779_v37  ;;  %v3107_v29 = vld [vmem:[%s4833_s4 + $0x48] sm:$0xff]  ;;  %v3990_v34 = vpack.c.bf16 %v3133_v33, %v3132_v32 }
 0x33e   : > { %v3951_v31 = vpack.c.bf16 %v3107_v29, %v3106_v28  ;;  %v2320_v37 = vld [vmem:[%s4833_s4 + $0x28] sm:$0xff] }
 0x350   : > { %v1949_v48 = vpop.f32.mrb[10].mxu1 }
 0x351   : > { %v1953_v50 = vadd.f32 %v1949_v48, %v1866_v39  ;;  %v3610_v51 = vpop.f32.mrb[11].mxu1  ;;  %v3963_v39 = vpack.c.bf16 %v2320_v37, %v2319_v36  ;;  %v3134_v36 = vld [vmem:[%s4838_s9 + $0x40] sm:$0xff] }
 0x352   : > { %v3113_v51 = vld [vmem:[%s4833_s4 + $0x68] sm:$0xff] }
 0x353   : > { %v1961_v52 = vadd.f32 %v3077_v49, %v1953_v50  ;;  %v3112_v50 = vld [vmem:[%s4833_s4 + $0x60] sm:$0xff] }
 0x355   : > { %v1962_v53 = vmax.f32 %v1961_v52, 0.0  ;;  %v3119_v52 = vld [vmem:[%s4833_s4 + $0x90] sm:$0xff] }
 0x357   : > { %1964 = vrot.lane.b32.xlu0 %v1962_v53, %s4044_s28  ;;  %v3120_v53 = vld [vmem:[%s4833_s4 + $0x98] sm:$0xff] }
 0x358   : > { %v3975_v55 = vpack.c.bf16 %v3120_v53, %v3119_v52 }
 0x3c9   : > { %v1965_v54 = vpop.permute.xlu0 %1964 }
 0x3ca   : > { %1968 = vst.msk [vmem:[#allocation4 + $0x1] sm:$0x1f] %vm1967_vm10, %v1965_v54  ;;  %v3966_v54 = vpack.c.bf16 %v3113_v51, %v3112_v50 }
 0x3d1   : > { %v1977_v2 = vld [vmem:[#allocation4 + $0x1] sm:$0xf] }
 0x3d2   : > { %v1969_v3 = vld [vmem:[#allocation4] sm:$0xf]  ;;  %3626 = vmatmul.mubr.msk.f32.vlgmr.msra.gmra.mrb[6].mxu0 %vm1986_vm11, %v1977_v2 }
 0x3d3   : > { %3643 = vmatmul.mubr.msk.f32.vlgmr.msra.gmra.mrb[12].mxu1 %vm1986_vm11, %v1969_v3  ;;  %3931 = vmatpush3.bf16.msra.mxu0 %v3930_v59  ;;  %v2133_v15 = vld [vmem:[#allocation4 + $0x2] sm:$0xf]  ;;  %v3123_v3 = vld [vmem:[%s4833_s4 + $0xb0] sm:$0xff] }
 0x3d4   : > { %3940 = vmatpush3.bf16.msra.mxu1 %v3939_v60  ;;  %3932 = vmatprep.subr.bf16.mxu0 %v4042_v5  ;;  %v2216_v16 = vld [vmem:[#allocation4 + $0x3] sm:$0xf] }
 0x3d5   : > { %3941 = vmatprep.subr.bf16.mxu1 %v4042_v5  ;;  %3659 = vmatprep.mubr.msk.f32.mxu0 %vm4043_vm6, %v4040_v1  ;;  %v3122_v59 = vld [vmem:[%s4833_s4 + $0xa8] sm:$0xff] }
 0x3d6   : > { %3676 = vmatprep.mubr.msk.f32.mxu1 %vm4043_vm6, %v4040_v1  ;;  %v3978_v63 = vpack.c.bf16 %v3122_v59, %v3121_v58  ;;  %v3117_v2 = vld [vmem:[%s4833_s4 + $0x88] sm:$0xff] }
 0x3d7   : > { %3934 = vmatpush3.bf16.msra.mxu0 %v3933_v4  ;;  %v3124_v4 = vld [vmem:[%s4833_s4 + $0xb8] sm:$0xff] }
 0x3d8   : > { %3943 = vmatpush3.bf16.msra.mxu1 %v3942_v6  ;;  %3935 = vmatprep.subr.bf16.mxu0 %v4042_v5  ;;  %v3972_v6 = vpack.c.bf16 %v3117_v2, %v3116_v0  ;;  %v3981_v7 = vpack.c.bf16 %v3124_v4, %v3123_v3 }
 0x3d9   : > { %3944 = vmatprep.subr.bf16.mxu1 %v4042_v5 }
 0x3db   : > { %3937 = vmatpush3.bf16.msra.mxu0 %v3936_v11  ;;  %v2651_v11 = vld [vmem:[%s4838_s9 + $0x8] sm:$0xff] }
 0x3dc   : > { %3946 = vmatpush3.bf16.msra.mxu1 %v3945_v12  ;;  %3657 = vmatprep.subr.mxu0 %v4040_v1  ;;  %v3984_v12 = vpack.c.bf16 %v2651_v11, %v2650_v10 }
 0x3dd   : > { %3674 = vmatprep.subr.mxu1 %v4040_v1 }
 0x3df   : > { %3658 = vmatpush3.msra.mxu0 %v3093_v13  ;;  %v2652_v13 = vld [vmem:[%s4838_s9 + $0x10] sm:$0xff] }
 0x3e0   : > { %3675 = vmatpush3.msra.mxu1 %v3101_v14  ;;  %3660 = vmatmul.mubr.msk.f32.vlgmr.msra.gmra.mrb[8].mxu0 %vm1986_vm11, %v2133_v15 }
 0x3e1   : > { %3677 = vmatmul.mubr.msk.f32.vlgmr.msra.gmra.mrb[14].mxu1 %vm1986_vm11, %v2216_v16  ;;  %3947 = vmatprep.subr.bf16.mxu0 %v4042_v5 }
 0x3e2   : > { %3956 = vmatprep.subr.bf16.mxu1 %v4042_v5  ;;  %3691 = vmatprep.mubr.msk.f32.mxu0 %vm4043_vm6, %v4040_v1 }
 0x3e3   : > { %3706 = vmatprep.mubr.msk.f32.mxu1 %vm4043_vm6, %v4040_v1  ;;  %3949 = vmatpush3.bf16.msra.mxu0 %v3948_v20 }
 0x3e4   : > { %3958 = vmatpush3.bf16.msra.mxu1 %v3957_v22  ;;  %3950 = vmatprep.subr.bf16.mxu0 %v4042_v5 }
 0x3e5   : > { %3959 = vmatprep.subr.bf16.mxu1 %v4042_v5 }
 0x3e7   : > { %3952 = vmatpush3.bf16.msra.mxu0 %v3951_v31  ;;  %v3130_v31 = vld [vmem:[%s4838_s9 + $0x28] sm:$0xff] }
 0x3e8   : > { %3961 = vmatpush3.bf16.msra.mxu1 %v3960_v35  ;;  %3953 = vmatprep.subr.bf16.mxu0 %v4042_v5 }
 0x3e9   : > { %3962 = vmatprep.subr.bf16.mxu1 %v4042_v5 }
 0x3eb   : > { %3955 = vmatpush3.bf16.msra.mxu0 %v3954_v38 }
 0x3ec   : > { %3964 = vmatpush3.bf16.msra.mxu1 %v3963_v39  ;;  %3965 = vmatprep.subr.bf16.mxu0 %v4042_v5 }
 0x3ed   : > { %3974 = vmatprep.subr.bf16.mxu1 %v4042_v5 }
 0x4a5   : > { %v2056_v23 = vpop.f32.mrb[6].mxu0 }
 0x4a6   : > { %v2129_v24 = vpop.f32.mrb[12].mxu1  ;;  %v3627_v26 = vpop.f32.mrb[7].mxu0 }
 0x4a7   : > { %v2130_v25 = vadd.f32 %v2129_v24, %v2056_v23  ;;  %v3644_v27 = vpop.f32.mrb[13].mxu1  ;;  %v3126_v24 = vld [vmem:[%s4837_s8] ss:$0 sm:$0xff]  ;;  %v3128_v26 = vld [vmem:[%s4838_s9 + $0x18] sm:$0xff] }
 0x4a8   : > { %v3129_v27 = vld [vmem:[%s4838_s9 + $0x20] sm:$0xff] }
 0x4a9   : > { %v3987_v29 = vpack.c.bf16 %v3129_v27, %v3128_v26 }
 0x4b3   : > { %v2211_v40 = vpop.f32.mrb[8].mxu0 }
 0x4b4   : > { %v2294_v41 = vpop.f32.mrb[14].mxu1  ;;  %v2215_v42 = vadd.f32 %v2211_v40, %v2130_v25  ;;  %v3661_v43 = vpop.f32.mrb[9].mxu0 }
 0x4b5   : > { %v3678_v44 = vpop.f32.mrb[15].mxu1 }
 0x4b6   : > { %v2298_v46 = vadd.f32 %v2294_v41, %v2215_v42 }
 0x4b8   : > { %v2306_v47 = vadd.f32 %v3103_v45, %v2298_v46 }
 0x4ba   : > { %v2307_v48 = vmax.f32 %v2306_v47, 0.0 }
 0x4bc   : > { %2309 = vrot.lane.b32.xlu1 %v2307_v48, %s4044_s28 }
 0x52e   : > { %v2310_v49 = vpop.permute.xlu1 %2309 }
 0x52f   : > { %2313 = vst.msk [vmem:[#allocation5 + $0x1] sm:$0xf] %vm2312_vm13, %v2310_v49 }
 0x536   : > { %v2321_v60 = vld [vmem:[#allocation5 + $0x1] sm:$0x7] }
 0x537   : > { %v2314_v61 = vld [vmem:[#allocation5] sm:$0x7]  ;;  %3692 = vmatmul.mubr.msk.f32.vlgmr.msra.gmra.mrb[10].mxu0 %vm2329_vm14, %v2321_v60  ;;  %v2558_v9 = vld [vmem:[#allocation5 + $0x3] sm:$0x7] }
 0x538   : > { %3707 = vmatmul.mubr.msk.f32.vlgmr.msra.gmra.mrb[16].mxu1 %vm2329_vm14, %v2314_v61  ;;  %3967 = vmatpush3.bf16.msra.mxu0 %v3966_v54  ;;  %v2476_v8 = vld [vmem:[#allocation5 + $0x2] sm:$0x7] }
 0x539   : > { %3976 = vmatpush3.bf16.msra.mxu1 %v3975_v55  ;;  %3968 = vmatprep.subr.bf16.mxu0 %v4042_v5 }
 0x53a   : > { %3977 = vmatprep.subr.bf16.mxu1 %v4042_v5  ;;  %3721 = vmatprep.mubr.msk.f32.mxu0 %vm4043_vm6, %v4040_v1 }
 0x53b   : > { %3736 = vmatprep.mubr.msk.f32.mxu1 %vm4043_vm6, %v4040_v1 }
 0x53c   : > { %3970 = vmatpush3.bf16.msra.mxu0 %v3969_v62 }
 0x53d   : > { %3979 = vmatpush3.bf16.msra.mxu1 %v3978_v63  ;;  %3971 = vmatprep.subr.bf16.mxu0 %v4042_v5 }
 0x53e   : > { %3980 = vmatprep.subr.bf16.mxu1 %v4042_v5 }
 0x540   : > { %3973 = vmatpush3.bf16.msra.mxu0 %v3972_v6 }
 0x541   : > { %3982 = vmatpush3.bf16.msra.mxu1 %v3981_v7  ;;  %3983 = vmatprep.subr.bf16.mxu0 %v4042_v5 }
 0x543   : > { %3722 = vmatmul.mubr.msk.f32.vlgmr.msra.gmra.mrb[12].mxu0 %vm2329_vm14, %v2476_v8 }
 0x544   : > { %3737 = vmatmul.mubr.msk.f32.vlgmr.msra.gmra.mrb[18].mxu1 %vm2329_vm14, %v2558_v9  ;;  %3745 = vmatprep.mubr.msk.f32.mxu0 %vm4043_vm6, %v4040_v1 }
 0x545   : > { %3985 = vmatpush3.bf16.msra.mxu0 %v3984_v12 }
 0x546   : > { %3743 = vmatprep.subr.mxu0 %v4040_v1 }
 0x549   : > { %3744 = vmatpush3.msra.mxu0 %v2652_v13 }
 0x54a   : > { %3986 = vmatprep.subr.bf16.mxu0 %v4042_v5 }
 0x60a   : > { %v2399_v14 = vpop.f32.mrb[10].mxu0 }
 0x60b   : > { %v2472_v15 = vpop.f32.mrb[16].mxu1  ;;  %v3693_v17 = vpop.f32.mrb[11].mxu0 }
 0x60c   : > { %v2473_v16 = vadd.f32 %v2472_v15, %v2399_v14  ;;  %v3708_v18 = vpop.f32.mrb[17].mxu1 }
 0x616   : > { %v2553_v19 = vpop.f32.mrb[12].mxu0 }
 0x617   : > { %v2635_v20 = vpop.f32.mrb[18].mxu1  ;;  %v2557_v21 = vadd.f32 %v2553_v19, %v2473_v16  ;;  %v3723_v22 = vpop.f32.mrb[13].mxu0 }
 0x618   : > { %v3738_v23 = vpop.f32.mrb[19].mxu1 }
 0x619   : > { %v2639_v25 = vadd.f32 %v2635_v20, %v2557_v21 }
 0x61b   : > { %v2647_v28 = vadd.f32 %v3126_v24, %v2639_v25 }
 0x61d   : > { %v2648_v30 = vmax.f32 %v2647_v28, 0.0 }
 0x61f   : > { %3746 = vmatmul.mubr.msk.f32.vlgmr.msra.gmra.mrb[14].mxu0 %vm2653_vm15, %v2648_v30  ;;  %v2732_v35 = vrot.slane %v2648_v30, 1  ;;  %v2810_v37 = vrot.slane %v2648_v30, 2 }
 0x620   : > { %3988 = vmatpush3.bf16.msra.mxu0 %v3987_v29  ;;  %3754 = vmatprep.mubr.msk.f32.mxu0 %vm4043_vm6, %v4040_v1 }
 0x621   : > { %3752 = vmatprep.subr.mxu0 %v4040_v1 }
 0x624   : > { %3753 = vmatpush3.msra.mxu0 %v3130_v31 }
 0x625   : > { %3989 = vmatprep.subr.bf16.mxu0 %v4042_v5  ;;  %v2649_v5 = vld [vmem:[%s4839_s10] sm:$0x1] }
 0x627   : > { %3755 = vmatmul.mubr.msk.f32.vlgmr.msra.gmra.mrb[14].mxu0 %vm2653_vm15, %v2732_v35 }
 0x628   : > { %3991 = vmatpush3.bf16.msra.mxu0 %v3990_v34  ;;  %3763 = vmatprep.mubr.msk.f32.mxu0 %vm4043_vm6, %v4040_v1 }
 0x629   : > { %3761 = vmatprep.subr.mxu0 %v4040_v1 }
 0x62c   : > { %3762 = vmatpush3.msra.mxu0 %v3134_v36 }
 0x62f   : > { %3764 = vmatmul.mubr.msk.f32.vlgmr.msra.gmra.mrb[14].mxu0 %vm2653_vm15, %v2810_v37 }
 0x702   : > { %v2879_v38 = vpop.f32.mrb[14].mxu0 }
 0x703   : > { %v3994_v39 = vadd.f32 %v2879_v38, %v2649_v5  ;;  %v3765_v40 = vpop.f32.mrb[15].mxu0 }
 0x705   : > { %v3136_v41 = vmul.f32 -1.442695, %v3994_v39 }
 0x707   : > { %4028 = vpow2.f32 %v3136_v41 }
 0x711   : > { %v4029_v42 = vpop.eup %4028 }
 0x712   : > { %v2887_v43 = vadd.f32 1.0, %v4029_v42 }
 0x714   : > { %4030 = vrcp.f32 %v2887_v43 }
 0x71e   : > { %v4031_v1 = vpop.eup %4030 }
 0x71f   : > { %2891 = vst.msk [vmem:[%s382_s27] sm:$0x1] %vm2890_vm0, %v4031_v1 }
 0x720 PF: > { %s21_s17 = sadd.s32 1, %s4038_s17  }
 0x721   : > { %p18_p4 = scmp.ge.s32.totalorder %s21_s17, 6  }
 0x723   :  { %20 = sbr.rel (!%p18_p4) target bundleno = 1 (0x1), region = 117 }

</bundles_post_ra>
